<compile_context>
chip_gen: v7x
topology: tpu7x:2x2x1
jax: 0.10.0
libtpu: 0.0.40
codegen_flags: <defaults>
</compile_context>

<pallas_src>
import functools

import jax
import jax.numpy as jnp
from jax.experimental import pallas as pl
from jax.experimental.pallas import tpu as pltpu

# Above the 16/32 MiB scoped defaults, below v7x's 64 MiB physical VMEM.
_VMEM_LIMIT_BYTES = 48 * 1024 * 1024


def _round_up(x, m):
    return (x + m - 1) // m * m


# ---------------- tiled matmul + bias (optionally fused sigmoid) ----------------
def _matmul_bias_act_kernel(x_ref, w_ref, b_ref, o_ref, *, sigmoid):
    y = jnp.dot(x_ref[...], w_ref[...], preferred_element_type=jnp.float32)
    y = y + b_ref[...]
    if sigmoid:
        y = jax.nn.sigmoid(y)
    o_ref[...] = y.astype(o_ref.dtype)


def matmul_bias(x2d, w_t, b2d, *, sigmoid=False, out_dtype=jnp.float32,
                row_tile=512, col_tile=512):
    """(N, K) @ (K, C) + (1, C) [-> sigmoid], tiled over rows and columns."""
    N, K = x2d.shape
    C = w_t.shape[1]
    tm = N if N <= row_tile else row_tile
    tn = C if C <= col_tile else col_tile
    Np = _round_up(N, tm)
    Cp = _round_up(C, tn)
    if Np != N:
        x2d = jnp.pad(x2d, ((0, Np - N), (0, 0)))
    if Cp != C:
        w_t = jnp.pad(w_t, ((0, 0), (0, Cp - C)))
        b2d = jnp.pad(b2d, ((0, 0), (0, Cp - C)))
    out = pl.pallas_call(
        functools.partial(_matmul_bias_act_kernel, sigmoid=sigmoid),
        out_shape=jax.ShapeDtypeStruct((Np, Cp), out_dtype),
        grid_spec=pltpu.PrefetchScalarGridSpec(
            num_scalar_prefetch=0,
            grid=(Np // tm, Cp // tn),
            in_specs=[
                pl.BlockSpec((tm, K), lambda i, j: (i, 0)),
                pl.BlockSpec((K, tn), lambda i, j: (0, j)),
                pl.BlockSpec((1, tn), lambda i, j: (0, j)),
            ],
            out_specs=pl.BlockSpec((tm, tn), lambda i, j: (i, j)),
        ),
        compiler_params=pltpu.CompilerParams(
            dimension_semantics=("parallel", "parallel"),
            vmem_limit_bytes=_VMEM_LIMIT_BYTES,
        ),
    )(x2d, w_t, b2d)
    if Np != N or Cp != C:
        out = out[:N, :C]
    return out


# ----------------------------- LSTM recurrence kernel ---------------------------
def _lstm_rec_kernel(gx_ref, whh_ref, out_ref, h_scr, c_scr, *, T, Hp):
    """Recurrent part of one LSTM layer, one (batch block, time chunk).

    gx_ref : (T, Bt, 4Hp) f32   precomputed x_t @ W_ih^T + (b_ih + b_hh)
    whh_ref: (Hp, 4Hp)    bf16  W_hh^T (resident across the grid)
    out_ref: (T, Bt, Hp)  bf16  hidden outputs for this chunk
    h_scr, c_scr: (Bt, Hp) f32  recurrent state, persists across time chunks
    """
    @pl.when(pl.program_id(1) == 0)          # first time chunk of this batch block
    def _():
        h_scr[...] = jnp.zeros_like(h_scr)
        c_scr[...] = jnp.zeros_like(c_scr)

    def step(t, carry):
        # Single recurrent matmul per step (input projection already hoisted).
        gates = gx_ref[t] + jnp.dot(
            h_scr[...].astype(whh_ref.dtype), whh_ref[...],
            preferred_element_type=jnp.float32)            # (Bt, 4Hp) f32
        i = jax.nn.sigmoid(gates[:, 0 * Hp:1 * Hp])        # lane-aligned slices
        f = jax.nn.sigmoid(gates[:, 1 * Hp:2 * Hp])
        g = jnp.tanh(gates[:, 2 * Hp:3 * Hp])
        o = jax.nn.sigmoid(gates[:, 3 * Hp:4 * Hp])
        c_new = f * c_scr[...] + i * g
        h_new = o * jnp.tanh(c_new)
        c_scr[...] = c_new
        h_scr[...] = h_new
        out_ref[t] = h_new.astype(out_ref.dtype)
        return carry

    jax.lax.fori_loop(0, T, step, 0, unroll=True)


def lstm_recurrence(gx_tm, whh_t, *, time_tile=8, batch_tile=128):
    """gx_tm: (S, Bp, 4Hp) f32, whh_t: (Hp, 4Hp) bf16 -> (S, Bp, Hp) bf16."""
    S, Bp, G4 = gx_tm.shape
    Hp = G4 // 4
    T = min(time_tile, S)
    Bt = min(batch_tile, Bp)
    Sp = _round_up(S, T)
    Bq = _round_up(Bp, Bt)
    if Sp != S or Bq != Bp:
        gx_tm = jnp.pad(gx_tm, ((0, Sp - S), (0, Bq - Bp), (0, 0)))
    out = pl.pallas_call(
        functools.partial(_lstm_rec_kernel, T=T, Hp=Hp),
        out_shape=jax.ShapeDtypeStruct((Sp, Bq, Hp), jnp.bfloat16),
        grid_spec=pltpu.PrefetchScalarGridSpec(
            num_scalar_prefetch=0,
            grid=(Bq // Bt, Sp // T),            # (batch blocks, time chunks)
            in_specs=[
                pl.BlockSpec((T, Bt, G4), lambda b, s: (s, b, 0)),
                # W_hh^T resident (constant block index).  On v7x with large H,
                # pipeline_mode=pl.Buffered(1) would avoid double-buffering the
                # resident weight block in the 64 MiB VMEM.
                pl.BlockSpec((Hp, G4), lambda b, s: (0, 0)),
            ],
            out_specs=pl.BlockSpec((T, Bt, Hp), lambda b, s: (s, b, 0)),
            scratch_shapes=[
                pltpu.VMEM((Bt, Hp), jnp.float32),   # h state
                pltpu.VMEM((Bt, Hp), jnp.float32),   # c state
            ],
        ),
        compiler_params=pltpu.CompilerParams(
            # Batch axis can megacore-split; time axis is the true recurrence.
            dimension_semantics=("parallel", "arbitrary"),
            vmem_limit_bytes=_VMEM_LIMIT_BYTES,
        ),
    )(gx_tm, whh_t)
    if Sp != S or Bq != Bp:
        out = out[:S, :Bp]
    return out


# --------------------------------- Parameter init -------------------------------
def init_rnn_params(key, input_dim, hidden_dim, output_dim, num_layer):
    """PyTorch-style uniform(-1/sqrt(H), 1/sqrt(H)) init, then padded/transposed
    into kernel layout: hidden padded to a 128-lane multiple (per-gate blocks),
    weights pre-transposed and cast to bf16, biases fused (b_ih + b_hh) in f32."""
    H, O = hidden_dim, output_dim
    Hp = _round_up(H, 128)
    Op = _round_up(O, 128)
    bound = 1.0 / (hidden_dim ** 0.5)

    def pad_gates_mat(w, d_in, d_in_pad):
        # (4H, d_in) -> (4Hp, d_in_pad); each i/f/g/o block padded independently.
        w4 = w.reshape(4, H, d_in)
        w4 = jnp.pad(w4, ((0, 0), (0, Hp - H), (0, d_in_pad - d_in)))
        return w4.reshape(4 * Hp, d_in_pad)

    def pad_gates_vec(b):
        return jnp.pad(b.reshape(4, H), ((0, 0), (0, Hp - H))).reshape(4 * Hp)

    params = {"lstm": [], "fc": None}
    for layer in range(num_layer):
        d_in = input_dim if layer == 0 else H
        d_in_pad = input_dim if layer == 0 else Hp
        key, k1, k2, k3, k4 = jax.random.split(key, 5)
        w_ih = jax.random.uniform(k1, (4 * H, d_in), jnp.float32, -bound, bound)
        w_hh = jax.random.uniform(k2, (4 * H, H), jnp.float32, -bound, bound)
        b_ih = jax.random.uniform(k3, (4 * H,), jnp.float32, -bound, bound)
        b_hh = jax.random.uniform(k4, (4 * H,), jnp.float32, -bound, bound)
        params["lstm"].append({
            "wih_t": pad_gates_mat(w_ih, d_in, d_in_pad).T.astype(jnp.bfloat16),
            "whh_t": pad_gates_mat(w_hh, H, Hp).T.astype(jnp.bfloat16),
            "b": pad_gates_vec(b_ih + b_hh).reshape(1, 4 * Hp),   # f32
        })
    key, k1, k2 = jax.random.split(key, 3)
    w_fc = jax.random.uniform(k1, (O, H), jnp.float32, -bound, bound)
    b_fc = jax.random.uniform(k2, (O,), jnp.float32, -bound, bound)
    w_fc_p = jnp.pad(w_fc, ((0, Op - O), (0, Hp - H)))
    b_fc_p = jnp.pad(b_fc, ((0, Op - O),))
    params["fc"] = {"w_t": w_fc_p.T.astype(jnp.bfloat16),
                    "b": b_fc_p.reshape(1, Op)}
    return params


# ------------------------------------ Forward ------------------------------------
@functools.partial(jax.jit, static_argnames=("output_dim",))
def rnn_forward(params, x, *, output_dim):
    """x: (batch, seq, input_dim) -> sigmoid(fc(lstm(x))): (batch, seq, output_dim)."""
    B, S, _ = x.shape
    Bp = _round_up(B, 8)                                # sublane-align batch
    x_tm = jnp.transpose(x, (1, 0, 2))                  # (S, B, D) time-major
    if Bp != B:
        x_tm = jnp.pad(x_tm, ((0, 0), (0, Bp - B), (0, 0)))
    h = x_tm.astype(jnp.bfloat16)                       # (S, Bp, D)
    for lp in params["lstm"]:
        d_in = h.shape[-1]
        # Hoisted input projection for the whole sequence: one big MXU matmul.
        gx = matmul_bias(h.reshape(S * Bp, d_in), lp["wih_t"], lp["b"],
                         out_dtype=jnp.float32)         # (S*Bp, 4Hp)
        gx = gx.reshape(S, Bp, -1)
        h = lstm_recurrence(gx, lp["whh_t"])            # (S, Bp, Hp) bf16
    Hp = h.shape[-1]
    # FC + sigmoid directly on time-major activations (no big transpose first).
    y = matmul_bias(h.reshape(S * Bp, Hp), params["fc"]["w_t"], params["fc"]["b"],
                    sigmoid=True, out_dtype=jnp.float32)  # (S*Bp, Op)
    y = y.reshape(S, Bp, -1)[:, :B, :output_dim]          # (S, B, O)
    return jnp.transpose(y, (1, 0, 2))                    # (B, S, O)


if __name__ == "__main__":
    # Small shapes consistent with the module's forward.
    batch, seq = 2, 8
    input_dim, hidden_dim, output_dim, num_layer = 16, 32, 4, 2

    key = jax.random.PRNGKey(0)
    key_p, key_x = jax.random.split(key)
    params = init_rnn_params(key_p, input_dim, hidden_dim, output_dim, num_layer)
    x = jax.random.normal(key_x, (batch, seq, input_dim), dtype=jnp.float32)

    out = rnn_forward(params, x, output_dim=output_dim)
    jax.block_until_ready(out)
    assert out.shape == (batch, seq, output_dim)
    assert bool(jnp.all(jnp.isfinite(out)))
    print("KERNEL_OK")
</pallas_src>

<mosaic_0001>
module attributes {stable_mosaic.version = 11 : i64} {
  func.func @_matmul_bias_act_kernel(%arg0: i32, %arg1: i32, %arg2: memref<64x16xbf16, #tpu.memory_space<vmem>>, %arg3: memref<16x512xbf16, #tpu.memory_space<vmem>>, %arg4: memref<1x512xf32, #tpu.memory_space<vmem>>, %arg5: memref<64x512xf32, #tpu.memory_space<vmem>>) attributes {dimension_semantics = [#tpu.dimension_semantics<parallel>, #tpu.dimension_semantics<parallel>], iteration_bounds = array<i64: 1, 1>, scalar_prefetch = 0 : i64, scratch_operands = 0 : i64, tpu.core_type = #tpu.core_type<tc>, window_params = [{transform_indices = @transform_0, window_bounds = array<i64: 64, 16>}, {transform_indices = @transform_1, window_bounds = array<i64: 16, 512>}, {transform_indices = @transform_2, window_bounds = array<i64: 1, 512>}, {transform_indices = @transform_3, window_bounds = array<i64: 64, 512>}]} {
    %c0 = arith.constant 0 : index
    %c0_0 = arith.constant 0 : index
    %0 = vector.load %arg2[%c0, %c0_0] : memref<64x16xbf16, #tpu.memory_space<vmem>>, vector<64x16xbf16>
    %c0_1 = arith.constant 0 : index
    %c0_2 = arith.constant 0 : index
    %1 = vector.load %arg3[%c0_1, %c0_2] : memref<16x512xbf16, #tpu.memory_space<vmem>>, vector<16x512xbf16>
    %cst = arith.constant dense<0.000000e+00> : vector<64x512xf32>
    %2 = tpu.matmul %0, %1, %cst {dimension_numbers = #tpu.dot_dimension_numbers<[1], [0], [0], [1], [0, 0, 1, 1], [], []>} : vector<64x16xbf16>, vector<16x512xbf16>, vector<64x512xf32> -> vector<64x512xf32>
    %c0_3 = arith.constant 0 : index
    %c0_4 = arith.constant 0 : index
    %3 = vector.load %arg4[%c0_3, %c0_4] : memref<1x512xf32, #tpu.memory_space<vmem>>, vector<1x512xf32>
    %4 = vector.broadcast %3 : vector<1x512xf32> to vector<64x512xf32>
    %5 = arith.addf %2, %4 : vector<64x512xf32>
    %c0_5 = arith.constant 0 : index
    %c0_6 = arith.constant 0 : index
    %6 = vector.load %arg5[%c0_5, %c0_6] : memref<64x512xf32, #tpu.memory_space<vmem>>, vector<64x512xf32>
    tpu.vector_store %arg5[%c0_5, %c0_6], %5 {strides = array<i32>} : memref<64x512xf32, #tpu.memory_space<vmem>>, vector<64x512xf32>,
    return
  }
  func.func @transform_0(%arg0: i32, %arg1: i32) -> (i32, i32) {
    %c0_i32 = arith.constant 0 : i32
    %c0_i32_0 = arith.constant 0 : i32
    return %arg0, %c0_i32 : i32, i32
  }
  func.func @transform_1(%arg0: i32, %arg1: i32) -> (i32, i32) {
    %c0_i32 = arith.constant 0 : i32
    %c0_i32_0 = arith.constant 0 : i32
    return %c0_i32, %arg1 : i32, i32
  }
  func.func @transform_2(%arg0: i32, %arg1: i32) -> (i32, i32) {
    %c0_i32 = arith.constant 0 : i32
    %c0_i32_0 = arith.constant 0 : i32
    return %c0_i32, %arg1 : i32, i32
  }
  func.func @transform_3(%arg0: i32, %arg1: i32) -> (i32, i32) {
    %c0_i32 = arith.constant 0 : i32
    return %arg0, %arg1 : i32, i32
  }
}

module attributes {stable_mosaic.version = 11 : i64} {
  func.func @_matmul_bias_act_kernel(%arg0: i32, %arg1: i32, %arg2: memref<64x128xbf16, #tpu.memory_space<vmem>>, %arg3: memref<128x128xbf16, #tpu.memory_space<vmem>>, %arg4: memref<1x128xf32, #tpu.memory_space<vmem>>, %arg5: memref<64x128xf32, #tpu.memory_space<vmem>>) attributes {dimension_semantics = [#tpu.dimension_semantics<parallel>, #tpu.dimension_semantics<parallel>], iteration_bounds = array<i64: 1, 1>, scalar_prefetch = 0 : i64, scratch_operands = 0 : i64, tpu.core_type = #tpu.core_type<tc>, window_params = [{transform_indices = @transform_0, window_bounds = array<i64: 64, 128>}, {transform_indices = @transform_1, window_bounds = array<i64: 128, 128>}, {transform_indices = @transform_2, window_bounds = array<i64: 1, 128>}, {transform_indices = @transform_3, window_bounds = array<i64: 64, 128>}]} {
    %c0 = arith.constant 0 : index
    %c0_0 = arith.constant 0 : index
    %0 = vector.load %arg2[%c0, %c0_0] : memref<64x128xbf16, #tpu.memory_space<vmem>>, vector<64x128xbf16>
    %c0_1 = arith.constant 0 : index
    %c0_2 = arith.constant 0 : index
    %1 = vector.load %arg3[%c0_1, %c0_2] : memref<128x128xbf16, #tpu.memory_space<vmem>>, vector<128x128xbf16>
    %cst = arith.constant dense<0.000000e+00> : vector<64x128xf32>
    %2 = tpu.matmul %0, %1, %cst {dimension_numbers = #tpu.dot_dimension_numbers<[1], [0], [0], [1], [0, 0, 1, 1], [], []>} : vector<64x128xbf16>, vector<128x128xbf16>, vector<64x128xf32> -> vector<64x128xf32>
    %c0_3 = arith.constant 0 : index
    %c0_4 = arith.constant 0 : index
    %3 = vector.load %arg4[%c0_3, %c0_4] : memref<1x128xf32, #tpu.memory_space<vmem>>, vector<1x128xf32>
    %4 = vector.broadcast %3 : vector<1x128xf32> to vector<64x128xf32>
    %5 = arith.addf %2, %4 : vector<64x128xf32>
    %6 = arith.negf %5 : vector<64x128xf32>
    %7 = math.exp %6 : vector<64x128xf32>
    %cst_5 = arith.constant 1.000000e+00 : f32
    %8 = vector.broadcast %cst_5 : f32 to vector<64x128xf32>
    %9 = arith.addf %8, %7 : vector<64x128xf32>
    %10 = arith.divf %8, %9 : vector<64x128xf32>
    %c0_6 = arith.constant 0 : index
    %c0_7 = arith.constant 0 : index
    %11 = vector.load %arg5[%c0_6, %c0_7] : memref<64x128xf32, #tpu.memory_space<vmem>>, vector<64x128xf32>
    tpu.vector_store %arg5[%c0_6, %c0_7], %10 {strides = array<i32>} : memref<64x128xf32, #tpu.memory_space<vmem>>, vector<64x128xf32>,
    return
  }
  func.func @transform_0(%arg0: i32, %arg1: i32) -> (i32, i32) {
    %c0_i32 = arith.constant 0 : i32
    %c0_i32_0 = arith.constant 0 : i32
    return %arg0, %c0_i32 : i32, i32
  }
  func.func @transform_1(%arg0: i32, %arg1: i32) -> (i32, i32) {
    %c0_i32 = arith.constant 0 : i32
    %c0_i32_0 = arith.constant 0 : i32
    return %c0_i32, %arg1 : i32, i32
  }
  func.func @transform_2(%arg0: i32, %arg1: i32) -> (i32, i32) {
    %c0_i32 = arith.constant 0 : i32
    %c0_i32_0 = arith.constant 0 : i32
    return %c0_i32, %arg1 : i32, i32
  }
  func.func @transform_3(%arg0: i32, %arg1: i32) -> (i32, i32) {
    %c0_i32 = arith.constant 0 : i32
    return %arg0, %arg1 : i32, i32
  }
}

module attributes {stable_mosaic.version = 11 : i64} {
  func.func @_matmul_bias_act_kernel(%arg0: i32, %arg1: i32, %arg2: memref<64x128xbf16, #tpu.memory_space<vmem>>, %arg3: memref<128x512xbf16, #tpu.memory_space<vmem>>, %arg4: memref<1x512xf32, #tpu.memory_space<vmem>>, %arg5: memref<64x512xf32, #tpu.memory_space<vmem>>) attributes {dimension_semantics = [#tpu.dimension_semantics<parallel>, #tpu.dimension_semantics<parallel>], iteration_bounds = array<i64: 1, 1>, scalar_prefetch = 0 : i64, scratch_operands = 0 : i64, tpu.core_type = #tpu.core_type<tc>, window_params = [{transform_indices = @transform_0, window_bounds = array<i64: 64, 128>}, {transform_indices = @transform_1, window_bounds = array<i64: 128, 512>}, {transform_indices = @transform_2, window_bounds = array<i64: 1, 512>}, {transform_indices = @transform_3, window_bounds = array<i64: 64, 512>}]} {
    %c0 = arith.constant 0 : index
    %c0_0 = arith.constant 0 : index
    %0 = vector.load %arg2[%c0, %c0_0] : memref<64x128xbf16, #tpu.memory_space<vmem>>, vector<64x128xbf16>
    %c0_1 = arith.constant 0 : index
    %c0_2 = arith.constant 0 : index
    %1 = vector.load %arg3[%c0_1, %c0_2] : memref<128x512xbf16, #tpu.memory_space<vmem>>, vector<128x512xbf16>
    %cst = arith.constant dense<0.000000e+00> : vector<64x512xf32>
    %2 = tpu.matmul %0, %1, %cst {dimension_numbers = #tpu.dot_dimension_numbers<[1], [0], [0], [1], [0, 0, 1, 1], [], []>} : vector<64x128xbf16>, vector<128x512xbf16>, vector<64x512xf32> -> vector<64x512xf32>
    %c0_3 = arith.constant 0 : index
    %c0_4 = arith.constant 0 : index
    %3 = vector.load %arg4[%c0_3, %c0_4] : memref<1x512xf32, #tpu.memory_space<vmem>>, vector<1x512xf32>
    %4 = vector.broadcast %3 : vector<1x512xf32> to vector<64x512xf32>
    %5 = arith.addf %2, %4 : vector<64x512xf32>
    %c0_5 = arith.constant 0 : index
    %c0_6 = arith.constant 0 : index
    %6 = vector.load %arg5[%c0_5, %c0_6] : memref<64x512xf32, #tpu.memory_space<vmem>>, vector<64x512xf32>
    tpu.vector_store %arg5[%c0_5, %c0_6], %5 {strides = array<i32>} : memref<64x512xf32, #tpu.memory_space<vmem>>, vector<64x512xf32>,
    return
  }
  func.func @transform_0(%arg0: i32, %arg1: i32) -> (i32, i32) {
    %c0_i32 = arith.constant 0 : i32
    %c0_i32_0 = arith.constant 0 : i32
    return %arg0, %c0_i32 : i32, i32
  }
  func.func @transform_1(%arg0: i32, %arg1: i32) -> (i32, i32) {
    %c0_i32 = arith.constant 0 : i32
    %c0_i32_0 = arith.constant 0 : i32
    return %c0_i32, %arg1 : i32, i32
  }
  func.func @transform_2(%arg0: i32, %arg1: i32) -> (i32, i32) {
    %c0_i32 = arith.constant 0 : i32
    %c0_i32_0 = arith.constant 0 : i32
    return %c0_i32, %arg1 : i32, i32
  }
  func.func @transform_3(%arg0: i32, %arg1: i32) -> (i32, i32) {
    %c0_i32 = arith.constant 0 : i32
    return %arg0, %arg1 : i32, i32
  }
}

module attributes {stable_mosaic.version = 11 : i64} {
  func.func @_lstm_rec_kernel(%arg0: i32, %arg1: i32, %arg2: memref<8x8x512xf32, #tpu.memory_space<vmem>>, %arg3: memref<128x512xbf16, #tpu.memory_space<vmem>>, %arg4: memref<8x8x128xbf16, #tpu.memory_space<vmem>>, %arg5: memref<8x128xf32, #tpu.memory_space<vmem>>, %arg6: memref<8x128xf32, #tpu.memory_space<vmem>>) attributes {dimension_semantics = [#tpu.dimension_semantics<parallel>, #tpu.dimension_semantics<arbitrary>], iteration_bounds = array<i64: 1, 1>, scalar_prefetch = 0 : i64, scratch_operands = 2 : i64, tpu.core_type = #tpu.core_type<tc>, window_params = [{transform_indices = @transform_0, window_bounds = array<i64: 8, 8, 512>}, {pipeline_mode = #tpu.pipeline_mode<synchronous>, transform_indices = @transform_1, window_bounds = array<i64: 128, 512>}, {transform_indices = @transform_2, window_bounds = array<i64: 8, 8, 128>}]} {
    %c0_i32 = arith.constant 0 : i32
    %0 = arith.cmpi eq, %arg1, %c0_i32 : i32
    %1 = arith.extui %0 : i1 to i32
    %c0_i32_0 = arith.constant 0 : i32
    %2 = arith.cmpi ne, %1, %c0_i32_0 : i32
    scf.if %2 {
      %cst_144 = arith.constant 0.000000e+00 : f32
      %331 = vector.broadcast %cst_144 : f32 to vector<8x128xf32>
      %c0_145 = arith.constant 0 : index
      %c0_146 = arith.constant 0 : index
      %332 = vector.load %arg5[%c0_145, %c0_146] : memref<8x128xf32, #tpu.memory_space<vmem>>, vector<8x128xf32>
      tpu.vector_store %arg5[%c0_145, %c0_146], %331 {strides = array<i32>} : memref<8x128xf32, #tpu.memory_space<vmem>>, vector<8x128xf32>,
      %cst_147 = arith.constant 0.000000e+00 : f32
      %333 = vector.broadcast %cst_147 : f32 to vector<8x128xf32>
      %c0_148 = arith.constant 0 : index
      %c0_149 = arith.constant 0 : index
      %334 = vector.load %arg6[%c0_148, %c0_149] : memref<8x128xf32, #tpu.memory_space<vmem>>, vector<8x128xf32>
      tpu.vector_store %arg6[%c0_148, %c0_149], %333 {strides = array<i32>} : memref<8x128xf32, #tpu.memory_space<vmem>>, vector<8x128xf32>,
    } else {
    }
    %c0_i32_1 = arith.constant 0 : i32
    %3 = arith.index_cast %c0_i32_1 : i32 to index
    %c0 = arith.constant 0 : index
    %c0_2 = arith.constant 0 : index
    %4 = vector.load %arg2[%3, %c0, %c0_2] : memref<8x8x512xf32, #tpu.memory_space<vmem>>, vector<1x8x512xf32>
    %5 = vector.shape_cast %4 : vector<1x8x512xf32> to vector<8x512xf32>
    %c0_3 = arith.constant 0 : index
    %c0_4 = arith.constant 0 : index
    %6 = vector.load %arg5[%c0_3, %c0_4] : memref<8x128xf32, #tpu.memory_space<vmem>>, vector<8x128xf32>
    %7 = arith.truncf %6 : vector<8x128xf32> to vector<8x128xbf16>
    %c0_5 = arith.constant 0 : index
    %c0_6 = arith.constant 0 : index
    %8 = vector.load %arg3[%c0_5, %c0_6] : memref<128x512xbf16, #tpu.memory_space<vmem>>, vector<128x512xbf16>
    %cst = arith.constant dense<0.000000e+00> : vector<8x512xf32>
    %9 = tpu.matmul %7, %8, %cst {dimension_numbers = #tpu.dot_dimension_numbers<[1], [0], [0], [1], [0, 0, 1, 1], [], []>} : vector<8x128xbf16>, vector<128x512xbf16>, vector<8x512xf32> -> vector<8x512xf32>
    %10 = arith.addf %5, %9 : vector<8x512xf32>
    %11 = vector.extract_strided_slice %10 {offsets = [0, 0], sizes = [8, 128], strides = [1, 1]} : vector<8x512xf32> to vector<8x128xf32>
    %12 = arith.negf %11 : vector<8x128xf32>
    %13 = math.exp %12 : vector<8x128xf32>
    %cst_7 = arith.constant 1.000000e+00 : f32
    %14 = vector.broadcast %cst_7 : f32 to vector<8x128xf32>
    %15 = arith.addf %14, %13 : vector<8x128xf32>
    %16 = arith.divf %14, %15 : vector<8x128xf32>
    %17 = vector.extract_strided_slice %10 {offsets = [0, 128], sizes = [8, 128], strides = [1, 1]} : vector<8x512xf32> to vector<8x128xf32>
    %18 = arith.negf %17 : vector<8x128xf32>
    %19 = math.exp %18 : vector<8x128xf32>
    %cst_8 = arith.constant 1.000000e+00 : f32
    %20 = vector.broadcast %cst_8 : f32 to vector<8x128xf32>
    %21 = arith.addf %20, %19 : vector<8x128xf32>
    %22 = arith.divf %20, %21 : vector<8x128xf32>
    %23 = vector.extract_strided_slice %10 {offsets = [0, 256], sizes = [8, 128], strides = [1, 1]} : vector<8x512xf32> to vector<8x128xf32>
    %24 = math.tanh %23 : vector<8x128xf32>
    %25 = vector.extract_strided_slice %10 {offsets = [0, 384], sizes = [8, 128], strides = [1, 1]} : vector<8x512xf32> to vector<8x128xf32>
    %26 = arith.negf %25 : vector<8x128xf32>
    %27 = math.exp %26 : vector<8x128xf32>
    %cst_9 = arith.constant 1.000000e+00 : f32
    %28 = vector.broadcast %cst_9 : f32 to vector<8x128xf32>
    %29 = arith.addf %28, %27 : vector<8x128xf32>
    %30 = arith.divf %28, %29 : vector<8x128xf32>
    %c0_10 = arith.constant 0 : index
    %c0_11 = arith.constant 0 : index
    %31 = vector.load %arg6[%c0_10, %c0_11] : memref<8x128xf32, #tpu.memory_space<vmem>>, vector<8x128xf32>
    %32 = arith.mulf %22, %31 : vector<8x128xf32>
    %33 = arith.mulf %16, %24 : vector<8x128xf32>
    %34 = arith.addf %32, %33 : vector<8x128xf32>
    %35 = math.tanh %34 : vector<8x128xf32>
    %36 = arith.mulf %30, %35 : vector<8x128xf32>
    %c0_12 = arith.constant 0 : index
    %c0_13 = arith.constant 0 : index
    %37 = vector.load %arg6[%c0_12, %c0_13] : memref<8x128xf32, #tpu.memory_space<vmem>>, vector<8x128xf32>
    tpu.vector_store %arg6[%c0_12, %c0_13], %34 {strides = array<i32>} : memref<8x128xf32, #tpu.memory_space<vmem>>, vector<8x128xf32>,
    %c0_14 = arith.constant 0 : index
    %c0_15 = arith.constant 0 : index
    %38 = vector.load %arg5[%c0_14, %c0_15] : memref<8x128xf32, #tpu.memory_space<vmem>>, vector<8x128xf32>
    tpu.vector_store %arg5[%c0_14, %c0_15], %36 {strides = array<i32>} : memref<8x128xf32, #tpu.memory_space<vmem>>, vector<8x128xf32>,
    %39 = arith.truncf %36 : vector<8x128xf32> to vector<8x128xbf16>
    %40 = arith.index_cast %c0_i32_1 : i32 to index
    %c0_16 = arith.constant 0 : index
    %c0_17 = arith.constant 0 : index
    %41 = vector.load %arg4[%40, %c0_16, %c0_17] : memref<8x8x128xbf16, #tpu.memory_space<vmem>>, vector<1x8x128xbf16>
    %42 = vector.shape_cast %41 : vector<1x8x128xbf16> to vector<8x128xbf16>
    %43 = vector.shape_cast %39 : vector<8x128xbf16> to vector<1x8x128xbf16>
    tpu.vector_store %arg4[%40, %c0_16, %c0_17], %43 {strides = array<i32>} : memref<8x8x128xbf16, #tpu.memory_space<vmem>>, vector<1x8x128xbf16>,
    %c1_i32 = arith.constant 1 : i32
    %44 = arith.index_cast %c1_i32 : i32 to index
    %c0_18 = arith.constant 0 : index
    %c0_19 = arith.constant 0 : index
    %45 = vector.load %arg2[%44, %c0_18, %c0_19] : memref<8x8x512xf32, #tpu.memory_space<vmem>>, vector<1x8x512xf32>
    %46 = vector.shape_cast %45 : vector<1x8x512xf32> to vector<8x512xf32>
    %c0_20 = arith.constant 0 : index
    %c0_21 = arith.constant 0 : index
    %47 = vector.load %arg5[%c0_20, %c0_21] : memref<8x128xf32, #tpu.memory_space<vmem>>, vector<8x128xf32>
    %48 = arith.truncf %47 : vector<8x128xf32> to vector<8x128xbf16>
    %c0_22 = arith.constant 0 : index
    %c0_23 = arith.constant 0 : index
    %49 = vector.load %arg3[%c0_22, %c0_23] : memref<128x512xbf16, #tpu.memory_space<vmem>>, vector<128x512xbf16>
    %cst_24 = arith.constant dense<0.000000e+00> : vector<8x512xf32>
    %50 = tpu.matmul %48, %49, %cst_24 {dimension_numbers = #tpu.dot_dimension_numbers<[1], [0], [0], [1], [0, 0, 1, 1], [], []>} : vector<8x128xbf16>, vector<128x512xbf16>, vector<8x512xf32> -> vector<8x512xf32>
    %51 = arith.addf %46, %50 : vector<8x512xf32>
    %52 = vector.extract_strided_slice %51 {offsets = [0, 0], sizes = [8, 128], strides = [1, 1]} : vector<8x512xf32> to vector<8x128xf32>
    %53 = arith.negf %52 : vector<8x128xf32>
    %54 = math.exp %53 : vector<8x128xf32>
    %cst_25 = arith.constant 1.000000e+00 : f32
    %55 = vector.broadcast %cst_25 : f32 to vector<8x128xf32>
    %56 = arith.addf %55, %54 : vector<8x128xf32>
    %57 = arith.divf %55, %56 : vector<8x128xf32>
    %58 = vector.extract_strided_slice %51 {offsets = [0, 128], sizes = [8, 128], strides = [1, 1]} : vector<8x512xf32> to vector<8x128xf32>
    %59 = arith.negf %58 : vector<8x128xf32>
    %60 = math.exp %59 : vector<8x128xf32>
    %cst_26 = arith.constant 1.000000e+00 : f32
    %61 = vector.broadcast %cst_26 : f32 to vector<8x128xf32>
    %62 = arith.addf %61, %60 : vector<8x128xf32>
    %63 = arith.divf %61, %62 : vector<8x128xf32>
    %64 = vector.extract_strided_slice %51 {offsets = [0, 256], sizes = [8, 128], strides = [1, 1]} : vector<8x512xf32> to vector<8x128xf32>
    %65 = math.tanh %64 : vector<8x128xf32>
    %66 = vector.extract_strided_slice %51 {offsets = [0, 384], sizes = [8, 128], strides = [1, 1]} : vector<8x512xf32> to vector<8x128xf32>
    %67 = arith.negf %66 : vector<8x128xf32>
    %68 = math.exp %67 : vector<8x128xf32>
    %cst_27 = arith.constant 1.000000e+00 : f32
    %69 = vector.broadcast %cst_27 : f32 to vector<8x128xf32>
    %70 = arith.addf %69, %68 : vector<8x128xf32>
    %71 = arith.divf %69, %70 : vector<8x128xf32>
    %c0_28 = arith.constant 0 : index
    %c0_29 = arith.constant 0 : index
    %72 = vector.load %arg6[%c0_28, %c0_29] : memref<8x128xf32, #tpu.memory_space<vmem>>, vector<8x128xf32>
    %73 = arith.mulf %63, %72 : vector<8x128xf32>
    %74 = arith.mulf %57, %65 : vector<8x128xf32>
    %75 = arith.addf %73, %74 : vector<8x128xf32>
    %76 = math.tanh %75 : vector<8x128xf32>
    %77 = arith.mulf %71, %76 : vector<8x128xf32>
    %c0_30 = arith.constant 0 : index
    %c0_31 = arith.constant 0 : index
    %78 = vector.load %arg6[%c0_30, %c0_31] : memref<8x128xf32, #tpu.memory_space<vmem>>, vector<8x128xf32>
    tpu.vector_store %arg6[%c0_30, %c0_31], %75 {strides = array<i32>} : memref<8x128xf32, #tpu.memory_space<vmem>>, vector<8x128xf32>,
    %c0_32 = arith.constant 0 : index
    %c0_33 = arith.constant 0 : index
    %79 = vector.load %arg5[%c0_32, %c0_33] : memref<8x128xf32, #tpu.memory_space<vmem>>, vector<8x128xf32>
    tpu.vector_store %arg5[%c0_32, %c0_33], %77 {strides = array<i32>} : memref<8x128xf32, #tpu.memory_space<vmem>>, vector<8x128xf32>,
    %80 = arith.truncf %77 : vector<8x128xf32> to vector<8x128xbf16>
    %81 = arith.index_cast %c1_i32 : i32 to index
    %c0_34 = arith.constant 0 : index
    %c0_35 = arith.constant 0 : index
    %82 = vector.load %arg4[%81, %c0_34, %c0_35] : memref<8x8x128xbf16, #tpu.memory_space<vmem>>, vector<1x8x128xbf16>
    %83 = vector.shape_cast %82 : vector<1x8x128xbf16> to vector<8x128xbf16>
    %84 = vector.shape_cast %80 : vector<8x128xbf16> to vector<1x8x128xbf16>
    tpu.vector_store %arg4[%81, %c0_34, %c0_35], %84 {strides = array<i32>} : memref<8x8x128xbf16, #tpu.memory_space<vmem>>, vector<1x8x128xbf16>,
    %c2_i32 = arith.constant 2 : i32
    %85 = arith.index_cast %c2_i32 : i32 to index
    %c0_36 = arith.constant 0 : index
    %c0_37 = arith.constant 0 : index
    %86 = vector.load %arg2[%85, %c0_36, %c0_37] : memref<8x8x512xf32, #tpu.memory_space<vmem>>, vector<1x8x512xf32>
    %87 = vector.shape_cast %86 : vector<1x8x512xf32> to vector<8x512xf32>
    %c0_38 = arith.constant 0 : index
    %c0_39 = arith.constant 0 : index
    %88 = vector.load %arg5[%c0_38, %c0_39] : memref<8x128xf32, #tpu.memory_space<vmem>>, vector<8x128xf32>
    %89 = arith.truncf %88 : vector<8x128xf32> to vector<8x128xbf16>
    %c0_40 = arith.constant 0 : index
    %c0_41 = arith.constant 0 : index
    %90 = vector.load %arg3[%c0_40, %c0_41] : memref<128x512xbf16, #tpu.memory_space<vmem>>, vector<128x512xbf16>
    %cst_42 = arith.constant dense<0.000000e+00> : vector<8x512xf32>
    %91 = tpu.matmul %89, %90, %cst_42 {dimension_numbers = #tpu.dot_dimension_numbers<[1], [0], [0], [1], [0, 0, 1, 1], [], []>} : vector<8x128xbf16>, vector<128x512xbf16>, vector<8x512xf32> -> vector<8x512xf32>
    %92 = arith.addf %87, %91 : vector<8x512xf32>
    %93 = vector.extract_strided_slice %92 {offsets = [0, 0], sizes = [8, 128], strides = [1, 1]} : vector<8x512xf32> to vector<8x128xf32>
    %94 = arith.negf %93 : vector<8x128xf32>
    %95 = math.exp %94 : vector<8x128xf32>
    %cst_43 = arith.constant 1.000000e+00 : f32
    %96 = vector.broadcast %cst_43 : f32 to vector<8x128xf32>
    %97 = arith.addf %96, %95 : vector<8x128xf32>
    %98 = arith.divf %96, %97 : vector<8x128xf32>
    %99 = vector.extract_strided_slice %92 {offsets = [0, 128], sizes = [8, 128], strides = [1, 1]} : vector<8x512xf32> to vector<8x128xf32>
    %100 = arith.negf %99 : vector<8x128xf32>
    %101 = math.exp %100 : vector<8x128xf32>
    %cst_44 = arith.constant 1.000000e+00 : f32
    %102 = vector.broadcast %cst_44 : f32 to vector<8x128xf32>
    %103 = arith.addf %102, %101 : vector<8x128xf32>
    %104 = arith.divf %102, %103 : vector<8x128xf32>
    %105 = vector.extract_strided_slice %92 {offsets = [0, 256], sizes = [8, 128], strides = [1, 1]} : vector<8x512xf32> to vector<8x128xf32>
    %106 = math.tanh %105 : vector<8x128xf32>
    %107 = vector.extract_strided_slice %92 {offsets = [0, 384], sizes = [8, 128], strides = [1, 1]} : vector<8x512xf32> to vector<8x128xf32>
    %108 = arith.negf %107 : vector<8x128xf32>
    %109 = math.exp %108 : vector<8x128xf32>
    %cst_45 = arith.constant 1.000000e+00 : f32
    %110 = vector.broadcast %cst_45 : f32 to vector<8x128xf32>
    %111 = arith.addf %110, %109 : vector<8x128xf32>
    %112 = arith.divf %110, %111 : vector<8x128xf32>
    %c0_46 = arith.constant 0 : index
    %c0_47 = arith.constant 0 : index
    %113 = vector.load %arg6[%c0_46, %c0_47] : memref<8x128xf32, #tpu.memory_space<vmem>>, vector<8x128xf32>
    %114 = arith.mulf %104, %113 : vector<8x128xf32>
    %115 = arith.mulf %98, %106 : vector<8x128xf32>
    %116 = arith.addf %114, %115 : vector<8x128xf32>
    %117 = math.tanh %116 : vector<8x128xf32>
    %118 = arith.mulf %112, %117 : vector<8x128xf32>
    %c0_48 = arith.constant 0 : index
    %c0_49 = arith.constant 0 : index
    %119 = vector.load %arg6[%c0_48, %c0_49] : memref<8x128xf32, #tpu.memory_space<vmem>>, vector<8x128xf32>
    tpu.vector_store %arg6[%c0_48, %c0_49], %116 {strides = array<i32>} : memref<8x128xf32, #tpu.memory_space<vmem>>, vector<8x128xf32>,
    %c0_50 = arith.constant 0 : index
    %c0_51 = arith.constant 0 : index
    %120 = vector.load %arg5[%c0_50, %c0_51] : memref<8x128xf32, #tpu.memory_space<vmem>>, vector<8x128xf32>
    tpu.vector_store %arg5[%c0_50, %c0_51], %118 {strides = array<i32>} : memref<8x128xf32, #tpu.memory_space<vmem>>, vector<8x128xf32>,
    %121 = arith.truncf %118 : vector<8x128xf32> to vector<8x128xbf16>
    %122 = arith.index_cast %c2_i32 : i32 to index
    %c0_52 = arith.constant 0 : index
    %c0_53 = arith.constant 0 : index
    %123 = vector.load %arg4[%122, %c0_52, %c0_53] : memref<8x8x128xbf16, #tpu.memory_space<vmem>>, vector<1x8x128xbf16>
    %124 = vector.shape_cast %123 : vector<1x8x128xbf16> to vector<8x128xbf16>
    %125 = vector.shape_cast %121 : vector<8x128xbf16> to vector<1x8x128xbf16>
    tpu.vector_store %arg4[%122, %c0_52, %c0_53], %125 {strides = array<i32>} : memref<8x8x128xbf16, #tpu.memory_space<vmem>>, vector<1x8x128xbf16>,
    %c3_i32 = arith.constant 3 : i32
    %126 = arith.index_cast %c3_i32 : i32 to index
    %c0_54 = arith.constant 0 : index
    %c0_55 = arith.constant 0 : index
    %127 = vector.load %arg2[%126, %c0_54, %c0_55] : memref<8x8x512xf32, #tpu.memory_space<vmem>>, vector<1x8x512xf32>
    %128 = vector.shape_cast %127 : vector<1x8x512xf32> to vector<8x512xf32>
    %c0_56 = arith.constant 0 : index
    %c0_57 = arith.constant 0 : index
    %129 = vector.load %arg5[%c0_56, %c0_57] : memref<8x128xf32, #tpu.memory_space<vmem>>, vector<8x128xf32>
    %130 = arith.truncf %129 : vector<8x128xf32> to vector<8x128xbf16>
    %c0_58 = arith.constant 0 : index
    %c0_59 = arith.constant 0 : index
    %131 = vector.load %arg3[%c0_58, %c0_59] : memref<128x512xbf16, #tpu.memory_space<vmem>>, vector<128x512xbf16>
    %cst_60 = arith.constant dense<0.000000e+00> : vector<8x512xf32>
    %132 = tpu.matmul %130, %131, %cst_60 {dimension_numbers = #tpu.dot_dimension_numbers<[1], [0], [0], [1], [0, 0, 1, 1], [], []>} : vector<8x128xbf16>, vector<128x512xbf16>, vector<8x512xf32> -> vector<8x512xf32>
    %133 = arith.addf %128, %132 : vector<8x512xf32>
    %134 = vector.extract_strided_slice %133 {offsets = [0, 0], sizes = [8, 128], strides = [1, 1]} : vector<8x512xf32> to vector<8x128xf32>
    %135 = arith.negf %134 : vector<8x128xf32>
    %136 = math.exp %135 : vector<8x128xf32>
    %cst_61 = arith.constant 1.000000e+00 : f32
    %137 = vector.broadcast %cst_61 : f32 to vector<8x128xf32>
    %138 = arith.addf %137, %136 : vector<8x128xf32>
    %139 = arith.divf %137, %138 : vector<8x128xf32>
    %140 = vector.extract_strided_slice %133 {offsets = [0, 128], sizes = [8, 128], strides = [1, 1]} : vector<8x512xf32> to vector<8x128xf32>
    %141 = arith.negf %140 : vector<8x128xf32>
    %142 = math.exp %141 : vector<8x128xf32>
    %cst_62 = arith.constant 1.000000e+00 : f32
    %143 = vector.broadcast %cst_62 : f32 to vector<8x128xf32>
    %144 = arith.addf %143, %142 : vector<8x128xf32>
    %145 = arith.divf %143, %144 : vector<8x128xf32>
    %146 = vector.extract_strided_slice %133 {offsets = [0, 256], sizes = [8, 128], strides = [1, 1]} : vector<8x512xf32> to vector<8x128xf32>
    %147 = math.tanh %146 : vector<8x128xf32>
    %148 = vector.extract_strided_slice %133 {offsets = [0, 384], sizes = [8, 128], strides = [1, 1]} : vector<8x512xf32> to vector<8x128xf32>
    %149 = arith.negf %148 : vector<8x128xf32>
    %150 = math.exp %149 : vector<8x128xf32>
    %cst_63 = arith.constant 1.000000e+00 : f32
    %151 = vector.broadcast %cst_63 : f32 to vector<8x128xf32>
    %152 = arith.addf %151, %150 : vector<8x128xf32>
    %153 = arith.divf %151, %152 : vector<8x128xf32>
    %c0_64 = arith.constant 0 : index
    %c0_65 = arith.constant 0 : index
    %154 = vector.load %arg6[%c0_64, %c0_65] : memref<8x128xf32, #tpu.memory_space<vmem>>, vector<8x128xf32>
    %155 = arith.mulf %145, %154 : vector<8x128xf32>
    %156 = arith.mulf %139, %147 : vector<8x128xf32>
    %157 = arith.addf %155, %156 : vector<8x128xf32>
    %158 = math.tanh %157 : vector<8x128xf32>
    %159 = arith.mulf %153, %158 : vector<8x128xf32>
    %c0_66 = arith.constant 0 : index
    %c0_67 = arith.constant 0 : index
    %160 = vector.load %arg6[%c0_66, %c0_67] : memref<8x128xf32, #tpu.memory_space<vmem>>, vector<8x128xf32>
    tpu.vector_store %arg6[%c0_66, %c0_67], %157 {strides = array<i32>} : memref<8x128xf32, #tpu.memory_space<vmem>>, vector<8x128xf32>,
    %c0_68 = arith.constant 0 : index
    %c0_69 = arith.constant 0 : index
    %161 = vector.load %arg5[%c0_68, %c0_69] : memref<8x128xf32, #tpu.memory_space<vmem>>, vector<8x128xf32>
    tpu.vector_store %arg5[%c0_68, %c0_69], %159 {strides = array<i32>} : memref<8x128xf32, #tpu.memory_space<vmem>>, vector<8x128xf32>,
    %162 = arith.truncf %159 : vector<8x128xf32> to vector<8x128xbf16>
    %163 = arith.index_cast %c3_i32 : i32 to index
    %c0_70 = arith.constant 0 : index
    %c0_71 = arith.constant 0 : index
    %164 = vector.load %arg4[%163, %c0_70, %c0_71] : memref<8x8x128xbf16, #tpu.memory_space<vmem>>, vector<1x8x128xbf16>
    %165 = vector.shape_cast %164 : vector<1x8x128xbf16> to vector<8x128xbf16>
    %166 = vector.shape_cast %162 : vector<8x128xbf16> to vector<1x8x128xbf16>
    tpu.vector_store %arg4[%163, %c0_70, %c0_71], %166 {strides = array<i32>} : memref<8x8x128xbf16, #tpu.memory_space<vmem>>, vector<1x8x128xbf16>,
    %c4_i32 = arith.constant 4 : i32
    %167 = arith.index_cast %c4_i32 : i32 to index
    %c0_72 = arith.constant 0 : index
    %c0_73 = arith.constant 0 : index
    %168 = vector.load %arg2[%167, %c0_72, %c0_73] : memref<8x8x512xf32, #tpu.memory_space<vmem>>, vector<1x8x512xf32>
    %169 = vector.shape_cast %168 : vector<1x8x512xf32> to vector<8x512xf32>
    %c0_74 = arith.constant 0 : index
    %c0_75 = arith.constant 0 : index
    %170 = vector.load %arg5[%c0_74, %c0_75] : memref<8x128xf32, #tpu.memory_space<vmem>>, vector<8x128xf32>
    %171 = arith.truncf %170 : vector<8x128xf32> to vector<8x128xbf16>
    %c0_76 = arith.constant 0 : index
    %c0_77 = arith.constant 0 : index
    %172 = vector.load %arg3[%c0_76, %c0_77] : memref<128x512xbf16, #tpu.memory_space<vmem>>, vector<128x512xbf16>
    %cst_78 = arith.constant dense<0.000000e+00> : vector<8x512xf32>
    %173 = tpu.matmul %171, %172, %cst_78 {dimension_numbers = #tpu.dot_dimension_numbers<[1], [0], [0], [1], [0, 0, 1, 1], [], []>} : vector<8x128xbf16>, vector<128x512xbf16>, vector<8x512xf32> -> vector<8x512xf32>
    %174 = arith.addf %169, %173 : vector<8x512xf32>
    %175 = vector.extract_strided_slice %174 {offsets = [0, 0], sizes = [8, 128], strides = [1, 1]} : vector<8x512xf32> to vector<8x128xf32>
    %176 = arith.negf %175 : vector<8x128xf32>
    %177 = math.exp %176 : vector<8x128xf32>
    %cst_79 = arith.constant 1.000000e+00 : f32
    %178 = vector.broadcast %cst_79 : f32 to vector<8x128xf32>
    %179 = arith.addf %178, %177 : vector<8x128xf32>
    %180 = arith.divf %178, %179 : vector<8x128xf32>
    %181 = vector.extract_strided_slice %174 {offsets = [0, 128], sizes = [8, 128], strides = [1, 1]} : vector<8x512xf32> to vector<8x128xf32>
    %182 = arith.negf %181 : vector<8x128xf32>
    %183 = math.exp %182 : vector<8x128xf32>
    %cst_80 = arith.constant 1.000000e+00 : f32
    %184 = vector.broadcast %cst_80 : f32 to vector<8x128xf32>
    %185 = arith.addf %184, %183 : vector<8x128xf32>
    %186 = arith.divf %184, %185 : vector<8x128xf32>
    %187 = vector.extract_strided_slice %174 {offsets = [0, 256], sizes = [8, 128], strides = [1, 1]} : vector<8x512xf32> to vector<8x128xf32>
    %188 = math.tanh %187 : vector<8x128xf32>
    %189 = vector.extract_strided_slice %174 {offsets = [0, 384], sizes = [8, 128], strides = [1, 1]} : vector<8x512xf32> to vector<8x128xf32>
    %190 = arith.negf %189 : vector<8x128xf32>
    %191 = math.exp %190 : vector<8x128xf32>
    %cst_81 = arith.constant 1.000000e+00 : f32
    %192 = vector.broadcast %cst_81 : f32 to vector<8x128xf32>
    %193 = arith.addf %192, %191 : vector<8x128xf32>
    %194 = arith.divf %192, %193 : vector<8x128xf32>
    %c0_82 = arith.constant 0 : index
    %c0_83 = arith.constant 0 : index
    %195 = vector.load %arg6[%c0_82, %c0_83] : memref<8x128xf32, #tpu.memory_space<vmem>>, vector<8x128xf32>
    %196 = arith.mulf %186, %195 : vector<8x128xf32>
    %197 = arith.mulf %180, %188 : vector<8x128xf32>
    %198 = arith.addf %196, %197 : vector<8x128xf32>
    %199 = math.tanh %198 : vector<8x128xf32>
    %200 = arith.mulf %194, %199 : vector<8x128xf32>
    %c0_84 = arith.constant 0 : index
    %c0_85 = arith.constant 0 : index
    %201 = vector.load %arg6[%c0_84, %c0_85] : memref<8x128xf32, #tpu.memory_space<vmem>>, vector<8x128xf32>
    tpu.vector_store %arg6[%c0_84, %c0_85], %198 {strides = array<i32>} : memref<8x128xf32, #tpu.memory_space<vmem>>, vector<8x128xf32>,
    %c0_86 = arith.constant 0 : index
    %c0_87 = arith.constant 0 : index
    %202 = vector.load %arg5[%c0_86, %c0_87] : memref<8x128xf32, #tpu.memory_space<vmem>>, vector<8x128xf32>
    tpu.vector_store %arg5[%c0_86, %c0_87], %200 {strides = array<i32>} : memref<8x128xf32, #tpu.memory_space<vmem>>, vector<8x128xf32>,
    %203 = arith.truncf %200 : vector<8x128xf32> to vector<8x128xbf16>
    %204 = arith.index_cast %c4_i32 : i32 to index
    %c0_88 = arith.constant 0 : index
    %c0_89 = arith.constant 0 : index
    %205 = vector.load %arg4[%204, %c0_88, %c0_89] : memref<8x8x128xbf16, #tpu.memory_space<vmem>>, vector<1x8x128xbf16>
    %206 = vector.shape_cast %205 : vector<1x8x128xbf16> to vector<8x128xbf16>
    %207 = vector.shape_cast %203 : vector<8x128xbf16> to vector<1x8x128xbf16>
    tpu.vector_store %arg4[%204, %c0_88, %c0_89], %207 {strides = array<i32>} : memref<8x8x128xbf16, #tpu.memory_space<vmem>>, vector<1x8x128xbf16>,
    %c5_i32 = arith.constant 5 : i32
    %208 = arith.index_cast %c5_i32 : i32 to index
    %c0_90 = arith.constant 0 : index
    %c0_91 = arith.constant 0 : index
    %209 = vector.load %arg2[%208, %c0_90, %c0_91] : memref<8x8x512xf32, #tpu.memory_space<vmem>>, vector<1x8x512xf32>
    %210 = vector.shape_cast %209 : vector<1x8x512xf32> to vector<8x512xf32>
    %c0_92 = arith.constant 0 : index
    %c0_93 = arith.constant 0 : index
    %211 = vector.load %arg5[%c0_92, %c0_93] : memref<8x128xf32, #tpu.memory_space<vmem>>, vector<8x128xf32>
    %212 = arith.truncf %211 : vector<8x128xf32> to vector<8x128xbf16>
    %c0_94 = arith.constant 0 : index
    %c0_95 = arith.constant 0 : index
    %213 = vector.load %arg3[%c0_94, %c0_95] : memref<128x512xbf16, #tpu.memory_space<vmem>>, vector<128x512xbf16>
    %cst_96 = arith.constant dense<0.000000e+00> : vector<8x512xf32>
    %214 = tpu.matmul %212, %213, %cst_96 {dimension_numbers = #tpu.dot_dimension_numbers<[1], [0], [0], [1], [0, 0, 1, 1], [], []>} : vector<8x128xbf16>, vector<128x512xbf16>, vector<8x512xf32> -> vector<8x512xf32>
    %215 = arith.addf %210, %214 : vector<8x512xf32>
    %216 = vector.extract_strided_slice %215 {offsets = [0, 0], sizes = [8, 128], strides = [1, 1]} : vector<8x512xf32> to vector<8x128xf32>
    %217 = arith.negf %216 : vector<8x128xf32>
    %218 = math.exp %217 : vector<8x128xf32>
    %cst_97 = arith.constant 1.000000e+00 : f32
    %219 = vector.broadcast %cst_97 : f32 to vector<8x128xf32>
    %220 = arith.addf %219, %218 : vector<8x128xf32>
    %221 = arith.divf %219, %220 : vector<8x128xf32>
    %222 = vector.extract_strided_slice %215 {offsets = [0, 128], sizes = [8, 128], strides = [1, 1]} : vector<8x512xf32> to vector<8x128xf32>
    %223 = arith.negf %222 : vector<8x128xf32>
    %224 = math.exp %223 : vector<8x128xf32>
    %cst_98 = arith.constant 1.000000e+00 : f32
    %225 = vector.broadcast %cst_98 : f32 to vector<8x128xf32>
    %226 = arith.addf %225, %224 : vector<8x128xf32>
    %227 = arith.divf %225, %226 : vector<8x128xf32>
    %228 = vector.extract_strided_slice %215 {offsets = [0, 256], sizes = [8, 128], strides = [1, 1]} : vector<8x512xf32> to vector<8x128xf32>
    %229 = math.tanh %228 : vector<8x128xf32>
    %230 = vector.extract_strided_slice %215 {offsets = [0, 384], sizes = [8, 128], strides = [1, 1]} : vector<8x512xf32> to vector<8x128xf32>
    %231 = arith.negf %230 : vector<8x128xf32>
    %232 = math.exp %231 : vector<8x128xf32>
    %cst_99 = arith.constant 1.000000e+00 : f32
    %233 = vector.broadcast %cst_99 : f32 to vector<8x128xf32>
    %234 = arith.addf %233, %232 : vector<8x128xf32>
    %235 = arith.divf %233, %234 : vector<8x128xf32>
    %c0_100 = arith.constant 0 : index
    %c0_101 = arith.constant 0 : index
    %236 = vector.load %arg6[%c0_100, %c0_101] : memref<8x128xf32, #tpu.memory_space<vmem>>, vector<8x128xf32>
    %237 = arith.mulf %227, %236 : vector<8x128xf32>
    %238 = arith.mulf %221, %229 : vector<8x128xf32>
    %239 = arith.addf %237, %238 : vector<8x128xf32>
    %240 = math.tanh %239 : vector<8x128xf32>
    %241 = arith.mulf %235, %240 : vector<8x128xf32>
    %c0_102 = arith.constant 0 : index
    %c0_103 = arith.constant 0 : index
    %242 = vector.load %arg6[%c0_102, %c0_103] : memref<8x128xf32, #tpu.memory_space<vmem>>, vector<8x128xf32>
    tpu.vector_store %arg6[%c0_102, %c0_103], %239 {strides = array<i32>} : memref<8x128xf32, #tpu.memory_space<vmem>>, vector<8x128xf32>,
    %c0_104 = arith.constant 0 : index
    %c0_105 = arith.constant 0 : index
    %243 = vector.load %arg5[%c0_104, %c0_105] : memref<8x128xf32, #tpu.memory_space<vmem>>, vector<8x128xf32>
    tpu.vector_store %arg5[%c0_104, %c0_105], %241 {strides = array<i32>} : memref<8x128xf32, #tpu.memory_space<vmem>>, vector<8x128xf32>,
    %244 = arith.truncf %241 : vector<8x128xf32> to vector<8x128xbf16>
    %245 = arith.index_cast %c5_i32 : i32 to index
    %c0_106 = arith.constant 0 : index
    %c0_107 = arith.constant 0 : index
    %246 = vector.load %arg4[%245, %c0_106, %c0_107] : memref<8x8x128xbf16, #tpu.memory_space<vmem>>, vector<1x8x128xbf16>
    %247 = vector.shape_cast %246 : vector<1x8x128xbf16> to vector<8x128xbf16>
    %248 = vector.shape_cast %244 : vector<8x128xbf16> to vector<1x8x128xbf16>
    tpu.vector_store %arg4[%245, %c0_106, %c0_107], %248 {strides = array<i32>} : memref<8x8x128xbf16, #tpu.memory_space<vmem>>, vector<1x8x128xbf16>,
    %c6_i32 = arith.constant 6 : i32
    %249 = arith.index_cast %c6_i32 : i32 to index
    %c0_108 = arith.constant 0 : index
    %c0_109 = arith.constant 0 : index
    %250 = vector.load %arg2[%249, %c0_108, %c0_109] : memref<8x8x512xf32, #tpu.memory_space<vmem>>, vector<1x8x512xf32>
    %251 = vector.shape_cast %250 : vector<1x8x512xf32> to vector<8x512xf32>
    %c0_110 = arith.constant 0 : index
    %c0_111 = arith.constant 0 : index
    %252 = vector.load %arg5[%c0_110, %c0_111] : memref<8x128xf32, #tpu.memory_space<vmem>>, vector<8x128xf32>
    %253 = arith.truncf %252 : vector<8x128xf32> to vector<8x128xbf16>
    %c0_112 = arith.constant 0 : index
    %c0_113 = arith.constant 0 : index
    %254 = vector.load %arg3[%c0_112, %c0_113] : memref<128x512xbf16, #tpu.memory_space<vmem>>, vector<128x512xbf16>
    %cst_114 = arith.constant dense<0.000000e+00> : vector<8x512xf32>
    %255 = tpu.matmul %253, %254, %cst_114 {dimension_numbers = #tpu.dot_dimension_numbers<[1], [0], [0], [1], [0, 0, 1, 1], [], []>} : vector<8x128xbf16>, vector<128x512xbf16>, vector<8x512xf32> -> vector<8x512xf32>
    %256 = arith.addf %251, %255 : vector<8x512xf32>
    %257 = vector.extract_strided_slice %256 {offsets = [0, 0], sizes = [8, 128], strides = [1, 1]} : vector<8x512xf32> to vector<8x128xf32>
    %258 = arith.negf %257 : vector<8x128xf32>
    %259 = math.exp %258 : vector<8x128xf32>
    %cst_115 = arith.constant 1.000000e+00 : f32
    %260 = vector.broadcast %cst_115 : f32 to vector<8x128xf32>
    %261 = arith.addf %260, %259 : vector<8x128xf32>
    %262 = arith.divf %260, %261 : vector<8x128xf32>
    %263 = vector.extract_strided_slice %256 {offsets = [0, 128], sizes = [8, 128], strides = [1, 1]} : vector<8x512xf32> to vector<8x128xf32>
    %264 = arith.negf %263 : vector<8x128xf32>
    %265 = math.exp %264 : vector<8x128xf32>
    %cst_116 = arith.constant 1.000000e+00 : f32
    %266 = vector.broadcast %cst_116 : f32 to vector<8x128xf32>
    %267 = arith.addf %266, %265 : vector<8x128xf32>
    %268 = arith.divf %266, %267 : vector<8x128xf32>
    %269 = vector.extract_strided_slice %256 {offsets = [0, 256], sizes = [8, 128], strides = [1, 1]} : vector<8x512xf32> to vector<8x128xf32>
    %270 = math.tanh %269 : vector<8x128xf32>
    %271 = vector.extract_strided_slice %256 {offsets = [0, 384], sizes = [8, 128], strides = [1, 1]} : vector<8x512xf32> to vector<8x128xf32>
    %272 = arith.negf %271 : vector<8x128xf32>
    %273 = math.exp %272 : vector<8x128xf32>
    %cst_117 = arith.constant 1.000000e+00 : f32
    %274 = vector.broadcast %cst_117 : f32 to vector<8x128xf32>
    %275 = arith.addf %274, %273 : vector<8x128xf32>
    %276 = arith.divf %274, %275 : vector<8x128xf32>
    %c0_118 = arith.constant 0 : index
    %c0_119 = arith.constant 0 : index
    %277 = vector.load %arg6[%c0_118, %c0_119] : memref<8x128xf32, #tpu.memory_space<vmem>>, vector<8x128xf32>
    %278 = arith.mulf %268, %277 : vector<8x128xf32>
    %279 = arith.mulf %262, %270 : vector<8x128xf32>
    %280 = arith.addf %278, %279 : vector<8x128xf32>
    %281 = math.tanh %280 : vector<8x128xf32>
    %282 = arith.mulf %276, %281 : vector<8x128xf32>
    %c0_120 = arith.constant 0 : index
    %c0_121 = arith.constant 0 : index
    %283 = vector.load %arg6[%c0_120, %c0_121] : memref<8x128xf32, #tpu.memory_space<vmem>>, vector<8x128xf32>
    tpu.vector_store %arg6[%c0_120, %c0_121], %280 {strides = array<i32>} : memref<8x128xf32, #tpu.memory_space<vmem>>, vector<8x128xf32>,
    %c0_122 = arith.constant 0 : index
    %c0_123 = arith.constant 0 : index
    %284 = vector.load %arg5[%c0_122, %c0_123] : memref<8x128xf32, #tpu.memory_space<vmem>>, vector<8x128xf32>
    tpu.vector_store %arg5[%c0_122, %c0_123], %282 {strides = array<i32>} : memref<8x128xf32, #tpu.memory_space<vmem>>, vector<8x128xf32>,
    %285 = arith.truncf %282 : vector<8x128xf32> to vector<8x128xbf16>
    %286 = arith.index_cast %c6_i32 : i32 to index
    %c0_124 = arith.constant 0 : index
    %c0_125 = arith.constant 0 : index
    %287 = vector.load %arg4[%286, %c0_124, %c0_125] : memref<8x8x128xbf16, #tpu.memory_space<vmem>>, vector<1x8x128xbf16>
    %288 = vector.shape_cast %287 : vector<1x8x128xbf16> to vector<8x128xbf16>
    %289 = vector.shape_cast %285 : vector<8x128xbf16> to vector<1x8x128xbf16>
    tpu.vector_store %arg4[%286, %c0_124, %c0_125], %289 {strides = array<i32>} : memref<8x8x128xbf16, #tpu.memory_space<vmem>>, vector<1x8x128xbf16>,
    %c7_i32 = arith.constant 7 : i32
    %290 = arith.index_cast %c7_i32 : i32 to index
    %c0_126 = arith.constant 0 : index
    %c0_127 = arith.constant 0 : index
    %291 = vector.load %arg2[%290, %c0_126, %c0_127] : memref<8x8x512xf32, #tpu.memory_space<vmem>>, vector<1x8x512xf32>
    %292 = vector.shape_cast %291 : vector<1x8x512xf32> to vector<8x512xf32>
    %c0_128 = arith.constant 0 : index
    %c0_129 = arith.constant 0 : index
    %293 = vector.load %arg5[%c0_128, %c0_129] : memref<8x128xf32, #tpu.memory_space<vmem>>, vector<8x128xf32>
    %294 = arith.truncf %293 : vector<8x128xf32> to vector<8x128xbf16>
    %c0_130 = arith.constant 0 : index
    %c0_131 = arith.constant 0 : index
    %295 = vector.load %arg3[%c0_130, %c0_131] : memref<128x512xbf16, #tpu.memory_space<vmem>>, vector<128x512xbf16>
    %cst_132 = arith.constant dense<0.000000e+00> : vector<8x512xf32>
    %296 = tpu.matmul %294, %295, %cst_132 {dimension_numbers = #tpu.dot_dimension_numbers<[1], [0], [0], [1], [0, 0, 1, 1], [], []>} : vector<8x128xbf16>, vector<128x512xbf16>, vector<8x512xf32> -> vector<8x512xf32>
    %297 = arith.addf %292, %296 : vector<8x512xf32>
    %298 = vector.extract_strided_slice %297 {offsets = [0, 0], sizes = [8, 128], strides = [1, 1]} : vector<8x512xf32> to vector<8x128xf32>
    %299 = arith.negf %298 : vector<8x128xf32>
    %300 = math.exp %299 : vector<8x128xf32>
    %cst_133 = arith.constant 1.000000e+00 : f32
    %301 = vector.broadcast %cst_133 : f32 to vector<8x128xf32>
    %302 = arith.addf %301, %300 : vector<8x128xf32>
    %303 = arith.divf %301, %302 : vector<8x128xf32>
    %304 = vector.extract_strided_slice %297 {offsets = [0, 128], sizes = [8, 128], strides = [1, 1]} : vector<8x512xf32> to vector<8x128xf32>
    %305 = arith.negf %304 : vector<8x128xf32>
    %306 = math.exp %305 : vector<8x128xf32>
    %cst_134 = arith.constant 1.000000e+00 : f32
    %307 = vector.broadcast %cst_134 : f32 to vector<8x128xf32>
    %308 = arith.addf %307, %306 : vector<8x128xf32>
    %309 = arith.divf %307, %308 : vector<8x128xf32>
    %310 = vector.extract_strided_slice %297 {offsets = [0, 256], sizes = [8, 128], strides = [1, 1]} : vector<8x512xf32> to vector<8x128xf32>
    %311 = math.tanh %310 : vector<8x128xf32>
    %312 = vector.extract_strided_slice %297 {offsets = [0, 384], sizes = [8, 128], strides = [1, 1]} : vector<8x512xf32> to vector<8x128xf32>
    %313 = arith.negf %312 : vector<8x128xf32>
    %314 = math.exp %313 : vector<8x128xf32>
    %cst_135 = arith.constant 1.000000e+00 : f32
    %315 = vector.broadcast %cst_135 : f32 to vector<8x128xf32>
    %316 = arith.addf %315, %314 : vector<8x128xf32>
    %317 = arith.divf %315, %316 : vector<8x128xf32>
    %c0_136 = arith.constant 0 : index
    %c0_137 = arith.constant 0 : index
    %318 = vector.load %arg6[%c0_136, %c0_137] : memref<8x128xf32, #tpu.memory_space<vmem>>, vector<8x128xf32>
    %319 = arith.mulf %309, %318 : vector<8x128xf32>
    %320 = arith.mulf %303, %311 : vector<8x128xf32>
    %321 = arith.addf %319, %320 : vector<8x128xf32>
    %322 = math.tanh %321 : vector<8x128xf32>
    %323 = arith.mulf %317, %322 : vector<8x128xf32>
    %c0_138 = arith.constant 0 : index
    %c0_139 = arith.constant 0 : index
    %324 = vector.load %arg6[%c0_138, %c0_139] : memref<8x128xf32, #tpu.memory_space<vmem>>, vector<8x128xf32>
    tpu.vector_store %arg6[%c0_138, %c0_139], %321 {strides = array<i32>} : memref<8x128xf32, #tpu.memory_space<vmem>>, vector<8x128xf32>,
    %c0_140 = arith.constant 0 : index
    %c0_141 = arith.constant 0 : index
    %325 = vector.load %arg5[%c0_140, %c0_141] : memref<8x128xf32, #tpu.memory_space<vmem>>, vector<8x128xf32>
    tpu.vector_store %arg5[%c0_140, %c0_141], %323 {strides = array<i32>} : memref<8x128xf32, #tpu.memory_space<vmem>>, vector<8x128xf32>,
    %326 = arith.truncf %323 : vector<8x128xf32> to vector<8x128xbf16>
    %327 = arith.index_cast %c7_i32 : i32 to index
    %c0_142 = arith.constant 0 : index
    %c0_143 = arith.constant 0 : index
    %328 = vector.load %arg4[%327, %c0_142, %c0_143] : memref<8x8x128xbf16, #tpu.memory_space<vmem>>, vector<1x8x128xbf16>
    %329 = vector.shape_cast %328 : vector<1x8x128xbf16> to vector<8x128xbf16>
    %330 = vector.shape_cast %326 : vector<8x128xbf16> to vector<1x8x128xbf16>
    tpu.vector_store %arg4[%327, %c0_142, %c0_143], %330 {strides = array<i32>} : memref<8x8x128xbf16, #tpu.memory_space<vmem>>, vector<1x8x128xbf16>,
    %c8_i32 = arith.constant 8 : i32
    return
  }
  func.func @transform_0(%arg0: i32, %arg1: i32) -> (i32, i32, i32) {
    %c0_i32 = arith.constant 0 : i32
    %c0_i32_0 = arith.constant 0 : i32
    return %arg1, %arg0, %c0_i32 : i32, i32, i32
  }
  func.func @transform_1(%arg0: i32, %arg1: i32) -> (i32, i32) {
    %c0_i32 = arith.constant 0 : i32
    %c0_i32_0 = arith.constant 0 : i32
    %c0_i32_1 = arith.constant 0 : i32
    return %c0_i32, %c0_i32_0 : i32, i32
  }
  func.func @transform_2(%arg0: i32, %arg1: i32) -> (i32, i32, i32) {
    %c0_i32 = arith.constant 0 : i32
    %c0_i32_0 = arith.constant 0 : i32
    return %arg1, %arg0, %c0_i32 : i32, i32, i32
  }
}

</mosaic_0001>

<bundles_post_ra>
// kernel: rnn_forward.5
= control target key start
LH: loop header
LB: loop body
LE: loop exit
PB: predicated region body
PF: predicated region fallthrough
CT: control target
= control target key end

     0   :  { %8 = vsyncpa [#allocation3], 0  ;;  %s349_s12 = smov [#allocation2]   ;;  %s551_s0 = inlined_call_operand.vmem [shape: bf16[64,16], index: 0, kind: input, shape index: {}]   ;;  %s552_s1 = inlined_call_operand.vmem [shape: bf16[16,512], index: 1, kind: input, shape index: {}]   ;;  %s553_s2 = inlined_call_operand.hbm [shape: f32[1,512], index: 2, kind: input, shape index: {}]   ;;  %s554_s3 = inlined_call_operand.vmem [shape: f32[64,512], index: 3, kind: output, shape index: {}]  }
   0x1   :  { %s19_s13 = sshll.u32 %s349_s12, 4  ;;  %s325_s16 = scalar_lea.hbm %s553_s2, 64  ;;  %s20_s13 = int_to_ptr.vmem [resolvable:$true] %s19_s13 }
   0x2   :  { %p326_p0 = scmp.ne.s32.totalorder %s553_s2, %s325_s16  ;;  %p329_p1 = scmp.lt.u32.totalorder %s325_s16, %s553_s2 }
   0x4   :  { %p331_p2 = pnand %p329_p1, %p326_p0 }
   0x6   :  { %334 = shalt.err (!%p331_p2)
}
   0x7   :  { %s335_s21 = scalar_lea.vmem %s20_s13, 64  ;;  %p340_p4 = scmp.lt.s32.totalorder %s20_s13, %s20_s13 }
   0x8   :  { %p336_p3 = scmp.ne.s32.totalorder %s20_s13, %s335_s21  ;;  %p341_p5 = scmp.lt.s32.totalorder %s335_s21, %s335_s21 }
   0xa   :  { %p342_p6 = por %p341_p5, %p340_p4 }
   0xc   :  { %p343_p7 = pnand %p342_p6, %p336_p3 }
   0xe   :  { %346 = shalt.err (!%p343_p7)
}
   0xf   :  { %22 = dma.hbm_to_vmem [thread:$0]  %s553_s2, 64, %s20_s13, [#allocation3]  }
  0x10   :  { %347 = dma.done.wait [#allocation3], 64  }
  0x11   :  { %348 = vsyncadd [#allocation3], 4294967232  ;;  %v350_v0 = vmov 0   ;;  %v315_v1 = vld [vmem:[%s552_s1 + $0x4] ss:$16 sps:$4 sm:$0xff]   ;;  %vm101_vm0 = vcmask 130048   ;;  %v41_v9 = vlaneseq }
  0x12   :  { %146 = vmatprep.mubr.bf16.mxu0 %v350_v0  ;;  %219 = vmatprep.mubr.bf16.mxu1 %v350_v0  ;;  %v317_v2 = vld [vmem:[%s552_s1 + $0xc] ss:$16 sps:$4 sm:$0xff]   ;;  %v319_v3 = vld [vmem:[%s552_s1] ss:$16 sps:$4 sm:$0xff]   ;;  %v320_v4 = vld [vmem:[%s552_s1 + $0x8] ss:$16 sps:$4 sm:$0xff]  }
  0x13   :  { %114 = vmatprep.subr.bf16.mxu0 %v315_v1  ;;  %187 = vmatprep.subr.bf16.mxu1 %v317_v2  ;;  %v321_v5 = vld [vmem:[%s551_s0] sm:$0xff]   ;;  %v322_v6 = vld [vmem:[%s551_s0 + $0x8] sm:$0xff]   ;;  %v323_v7 = vld [vmem:[%s551_s0 + $0x10] sm:$0xff]   ;;  %v42_v10 = vshrl.u32 %v41_v9, 7 }
  0x14   :  { %115 = vmatpush1.bf16.msra.mxu0 %v319_v3  ;;  %188 = vmatpush1.bf16.msra.mxu1 %v320_v4  ;;  %v324_v8 = vld [vmem:[%s551_s0 + $0x18] sm:$0xff]   ;;  %v39_v13 = vld [vmem:[#allocation2] sm:$0xf] }
  0x15   :  { %v43_v11 = vsub.s32 0, %v42_v10  ;;  %v51_v12 = vsub.s32 2, %v42_v10  ;;  %v47_v14 = vsub.s32 1, %v42_v10  ;;  %v55_v15 = vsub.s32 3, %v42_v10 }
  0x17   :  { %305 = vmatmul.mubr.msk.bf16.vlgmr.msra.gmra.mrb[0].mxu0 %vm101_vm0, %v321_v5  ;;  %309 = vmatmul.mubr.msk.bf16.vlgmr.msra.gmra.mrb[0].mxu1 %vm101_vm0, %v321_v5  ;;  %v415_v16 = vrot.slane %v39_v13, %v43_v11  ;;  %v417_v17 = vrot.slane %v39_v13, %v51_v12  ;;  %v419_v18 = vrot.slane %v39_v13, %v47_v14 }
  0x18   :  { %156 = vmatprep.mubr.bf16.mxu0 %v350_v0  ;;  %229 = vmatprep.mubr.bf16.mxu1 %v350_v0  ;;  %v421_v19 = vrot.slane %v39_v13, %v55_v15 }
  0x1f   :  { %306 = vmatmul.mubr.msk.bf16.gmra.mrb[4].mxu0 %vm101_vm0, %v322_v6  ;;  %310 = vmatmul.mubr.msk.bf16.gmra.mrb[4].mxu1 %vm101_vm0, %v322_v6 }
  0x20   :  { %166 = vmatprep.mubr.bf16.mxu0 %v350_v0  ;;  %239 = vmatprep.mubr.bf16.mxu1 %v350_v0 }
  0x27   :  { %307 = vmatmul.mubr.msk.bf16.gmra.mrb[8].mxu0 %vm101_vm0, %v323_v7  ;;  %311 = vmatmul.mubr.msk.bf16.gmra.mrb[8].mxu1 %vm101_vm0, %v323_v7 }
  0x28   :  { %176 = vmatprep.mubr.bf16.mxu0 %v350_v0  ;;  %249 = vmatprep.mubr.bf16.mxu1 %v350_v0 }
  0x2f   :  { %308 = vmatmul.mubr.msk.bf16.gmra.mrb[12].mxu0 %vm101_vm0, %v324_v8  ;;  %312 = vmatmul.mubr.msk.bf16.gmra.mrb[12].mxu1 %vm101_vm0, %v324_v8 }
  0xea   :  { %v148_v20 = vpop.f32.mrb[0].mxu0  ;;  %v221_v21 = vpop.f32.mrb[0].mxu1 }
  0xeb   :  { %v149_v22 = vadd.f32 %v148_v20, %v415_v16  ;;  %v222_v23 = vadd.f32 %v221_v21, %v417_v17  ;;  %v150_v24 = vpop.f32.mrb[1].mxu0  ;;  %v223_v25 = vpop.f32.mrb[1].mxu1 }
  0xec   :  { %v151_v26 = vadd.f32 %v150_v24, %v419_v18  ;;  %v224_v27 = vadd.f32 %v223_v25, %v421_v19  ;;  %v152_v28 = vpop.f32.mrb[2].mxu0  ;;  %v225_v29 = vpop.f32.mrb[2].mxu1 }
  0xed   :  { %260 = vst [vmem:[%s554_s3] sm:$0xff] %v149_v22  ;;  %262 = vst [vmem:[%s554_s3 + $0x10] sm:$0xff] %v222_v23  ;;  %v153_v30 = vadd.f32 %v152_v28, %v415_v16  ;;  %v226_v31 = vadd.f32 %v225_v29, %v417_v17  ;;  %v154_v32 = vpop.f32.mrb[3].mxu0  ;;  %v227_v33 = vpop.f32.mrb[3].mxu1 }
  0xee   :  { %261 = vst [vmem:[%s554_s3 + $0x8] sm:$0xff] %v151_v26  ;;  %263 = vst [vmem:[%s554_s3 + $0x18] sm:$0xff] %v224_v27  ;;  %v155_v34 = vadd.f32 %v154_v32, %v419_v18  ;;  %v228_v35 = vadd.f32 %v227_v33, %v421_v19 }
  0xef   :  { %264 = vst [vmem:[%s554_s3 + $0x20] sm:$0xff] %v153_v30  ;;  %266 = vst [vmem:[%s554_s3 + $0x30] sm:$0xff] %v226_v31 }
  0xf0   :  { %265 = vst [vmem:[%s554_s3 + $0x28] sm:$0xff] %v155_v34  ;;  %267 = vst [vmem:[%s554_s3 + $0x38] sm:$0xff] %v228_v35 }
  0xf2   :  { %v158_v36 = vpop.f32.mrb[4].mxu0  ;;  %v231_v37 = vpop.f32.mrb[4].mxu1 }
  0xf3   :  { %v159_v38 = vadd.f32 %v158_v36, %v415_v16  ;;  %v232_v39 = vadd.f32 %v231_v37, %v417_v17  ;;  %v160_v40 = vpop.f32.mrb[5].mxu0  ;;  %v233_v41 = vpop.f32.mrb[5].mxu1 }
  0xf4   :  { %v161_v42 = vadd.f32 %v160_v40, %v419_v18  ;;  %v234_v43 = vadd.f32 %v233_v41, %v421_v19  ;;  %v162_v44 = vpop.f32.mrb[6].mxu0  ;;  %v235_v45 = vpop.f32.mrb[6].mxu1 }
  0xf5   :  { %268 = vst [vmem:[%s554_s3 + $0x40] sm:$0xff] %v159_v38  ;;  %270 = vst [vmem:[%s554_s3 + $0x50] sm:$0xff] %v232_v39  ;;  %v163_v46 = vadd.f32 %v162_v44, %v415_v16  ;;  %v236_v47 = vadd.f32 %v235_v45, %v417_v17  ;;  %v164_v48 = vpop.f32.mrb[7].mxu0  ;;  %v237_v49 = vpop.f32.mrb[7].mxu1 }
  0xf6   :  { %269 = vst [vmem:[%s554_s3 + $0x48] sm:$0xff] %v161_v42  ;;  %271 = vst [vmem:[%s554_s3 + $0x58] sm:$0xff] %v234_v43  ;;  %v165_v50 = vadd.f32 %v164_v48, %v419_v18  ;;  %v238_v51 = vadd.f32 %v237_v49, %v421_v19 }
  0xf7   :  { %272 = vst [vmem:[%s554_s3 + $0x60] sm:$0xff] %v163_v46  ;;  %274 = vst [vmem:[%s554_s3 + $0x70] sm:$0xff] %v236_v47 }
  0xf8   :  { %273 = vst [vmem:[%s554_s3 + $0x68] sm:$0xff] %v165_v50  ;;  %275 = vst [vmem:[%s554_s3 + $0x78] sm:$0xff] %v238_v51 }
  0xfa   :  { %v168_v52 = vpop.f32.mrb[8].mxu0  ;;  %v241_v53 = vpop.f32.mrb[8].mxu1 }
  0xfb   :  { %v169_v54 = vadd.f32 %v168_v52, %v415_v16  ;;  %v242_v55 = vadd.f32 %v241_v53, %v417_v17  ;;  %v170_v56 = vpop.f32.mrb[9].mxu0  ;;  %v243_v57 = vpop.f32.mrb[9].mxu1 }
  0xfc   :  { %v171_v58 = vadd.f32 %v170_v56, %v419_v18  ;;  %v244_v59 = vadd.f32 %v243_v57, %v421_v19  ;;  %v172_v60 = vpop.f32.mrb[10].mxu0  ;;  %v245_v61 = vpop.f32.mrb[10].mxu1 }
  0xfd   :  { %276 = vst [vmem:[%s554_s3 + $0x80] sm:$0xff] %v169_v54  ;;  %278 = vst [vmem:[%s554_s3 + $0x90] sm:$0xff] %v242_v55  ;;  %v173_v62 = vadd.f32 %v172_v60, %v415_v16  ;;  %v246_v63 = vadd.f32 %v245_v61, %v417_v17  ;;  %v174_v0 = vpop.f32.mrb[11].mxu0  ;;  %v247_v1 = vpop.f32.mrb[11].mxu1 }
  0xfe   :  { %277 = vst [vmem:[%s554_s3 + $0x88] sm:$0xff] %v171_v58  ;;  %279 = vst [vmem:[%s554_s3 + $0x98] sm:$0xff] %v244_v59  ;;  %v175_v2 = vadd.f32 %v174_v0, %v419_v18  ;;  %v248_v3 = vadd.f32 %v247_v1, %v421_v19 }
  0xff   :  { %280 = vst [vmem:[%s554_s3 + $0xa0] sm:$0xff] %v173_v62  ;;  %282 = vst [vmem:[%s554_s3 + $0xb0] sm:$0xff] %v246_v63 }
 0x100   :  { %281 = vst [vmem:[%s554_s3 + $0xa8] sm:$0xff] %v175_v2  ;;  %283 = vst [vmem:[%s554_s3 + $0xb8] sm:$0xff] %v248_v3 }
 0x102   :  { %v178_v4 = vpop.f32.mrb[12].mxu0  ;;  %v251_v5 = vpop.f32.mrb[12].mxu1 }
 0x103   :  { %v179_v6 = vadd.f32 %v178_v4, %v415_v16  ;;  %v252_v7 = vadd.f32 %v251_v5, %v417_v17  ;;  %v180_v8 = vpop.f32.mrb[13].mxu0  ;;  %v253_v9 = vpop.f32.mrb[13].mxu1 }
 0x104   :  { %v181_v10 = vadd.f32 %v180_v8, %v419_v18  ;;  %v254_v11 = vadd.f32 %v253_v9, %v421_v19  ;;  %v182_v12 = vpop.f32.mrb[14].mxu0  ;;  %v255_v13 = vpop.f32.mrb[14].mxu1 }
 0x105   :  { %284 = vst [vmem:[%s554_s3 + $0xc0] sm:$0xff] %v179_v6  ;;  %286 = vst [vmem:[%s554_s3 + $0xd0] sm:$0xff] %v252_v7  ;;  %v183_v14 = vadd.f32 %v182_v12, %v415_v16  ;;  %v256_v15 = vadd.f32 %v255_v13, %v417_v17  ;;  %v184_v20 = vpop.f32.mrb[15].mxu0  ;;  %v257_v21 = vpop.f32.mrb[15].mxu1 }
 0x106   :  { %285 = vst [vmem:[%s554_s3 + $0xc8] sm:$0xff] %v181_v10  ;;  %287 = vst [vmem:[%s554_s3 + $0xd8] sm:$0xff] %v254_v11  ;;  %v185_v22 = vadd.f32 %v184_v20, %v419_v18  ;;  %v258_v23 = vadd.f32 %v257_v21, %v421_v19 }
 0x107   :  { %288 = vst [vmem:[%s554_s3 + $0xe0] sm:$0xff] %v183_v14  ;;  %290 = vst [vmem:[%s554_s3 + $0xf0] sm:$0xff] %v256_v15 }
 0x108   :  { %289 = vst [vmem:[%s554_s3 + $0xe8] sm:$0xff] %v185_v22  ;;  %291 = vst [vmem:[%s554_s3 + $0xf8] sm:$0xff] %v258_v23 }
 0x109   :  { %296 = vsyncpa [#allocation3], 1 }

// kernel: rnn_forward.9
= control target key start
LH: loop header
LB: loop body
LE: loop exit
PB: predicated region body
PF: predicated region fallthrough
CT: control target
= control target key end

     0   :  { %s443_s1 = inlined_call_operand.vmem [shape: bf16[128,128], index: 1, kind: input, shape index: {}]   ;;  %s444_s0 = inlined_call_operand.vmem [shape: bf16[64,128], index: 0, kind: input, shape index: {}]   ;;  %s445_s2 = inlined_call_operand.vmem [shape: f32[1,128], index: 2, kind: input, shape index: {}]   ;;  %s446_s3 = inlined_call_operand.vmem [shape: f32[64,128], index: 3, kind: output, shape index: {}]  }
   0x1   :  { %v316_v0 = vld [vmem:[%s443_s1] sm:$0xff]   ;;  %v317_v1 = vld [vmem:[%s443_s1 + $0x8] sm:$0xff]   ;;  %v318_v2 = vld [vmem:[%s443_s1 + $0x10] sm:$0xff]  }
   0x2   :  { %276 = vmatprep.subr.bf16.mxu0 %v316_v0  ;;  %300 = vmatprep.subr.bf16.mxu1 %v316_v0  ;;  %v319_v3 = vld [vmem:[%s443_s1 + $0x18] sm:$0xff]   ;;  %v324_v4 = vld [vmem:[%s444_s0] sm:$0xff]   ;;  %v325_v5 = vld [vmem:[%s444_s0 + $0x10] sm:$0xff]  }
   0x3   :  { %277 = vmatpush3.bf16.msra.mxu0 %v316_v0  ;;  %308 = vmatpush3.bf16.msra.mxu1 %v316_v0  ;;  %v320_v6 = vld [vmem:[%s443_s1 + $0x20] sm:$0xff]   ;;  %v321_v7 = vld [vmem:[%s443_s1 + $0x28] sm:$0xff]   ;;  %v322_v8 = vld [vmem:[%s443_s1 + $0x30] sm:$0xff]  }
   0x4   :  { %278 = vmatprep.subr.bf16.mxu0 %v317_v1  ;;  %301 = vmatprep.subr.bf16.mxu1 %v317_v1  ;;  %v323_v9 = vld [vmem:[%s443_s1 + $0x38] sm:$0xff]   ;;  %v326_v10 = vld [vmem:[%s444_s0 + $0x8] sm:$0xff]   ;;  %v243_v12 = vld [vmem:[%s445_s2] ss:$0 sm:$0xff] }
   0x5   :  { %292 = vmatprep.mubr.bf16.mxu0 %v324_v4  ;;  %296 = vmatprep.mubr.bf16.mxu1 %v325_v5  ;;  %v327_v11 = vld [vmem:[%s444_s0 + $0x18] sm:$0xff]  }
   0x7   :  { %279 = vmatpush3.bf16.msra.mxu0 %v317_v1  ;;  %309 = vmatpush3.bf16.msra.mxu1 %v317_v1 }
   0x8   :  { %280 = vmatprep.subr.bf16.mxu0 %v318_v2  ;;  %302 = vmatprep.subr.bf16.mxu1 %v318_v2 }
   0xb   :  { %281 = vmatpush3.bf16.msra.mxu0 %v318_v2  ;;  %310 = vmatpush3.bf16.msra.mxu1 %v318_v2 }
   0xc   :  { %282 = vmatprep.subr.bf16.mxu0 %v319_v3  ;;  %303 = vmatprep.subr.bf16.mxu1 %v319_v3 }
   0xf   :  { %283 = vmatpush3.bf16.msra.mxu0 %v319_v3  ;;  %311 = vmatpush3.bf16.msra.mxu1 %v319_v3 }
  0x10   :  { %284 = vmatprep.subr.bf16.mxu0 %v320_v6  ;;  %304 = vmatprep.subr.bf16.mxu1 %v320_v6 }
  0x13   :  { %285 = vmatpush3.bf16.msra.mxu0 %v320_v6  ;;  %312 = vmatpush3.bf16.msra.mxu1 %v320_v6 }
  0x14   :  { %286 = vmatprep.subr.bf16.mxu0 %v321_v7  ;;  %305 = vmatprep.subr.bf16.mxu1 %v321_v7 }
  0x17   :  { %287 = vmatpush3.bf16.msra.mxu0 %v321_v7  ;;  %313 = vmatpush3.bf16.msra.mxu1 %v321_v7 }
  0x18   :  { %288 = vmatprep.subr.bf16.mxu0 %v322_v8  ;;  %306 = vmatprep.subr.bf16.mxu1 %v322_v8 }
  0x1b   :  { %289 = vmatpush3.bf16.msra.mxu0 %v322_v8  ;;  %314 = vmatpush3.bf16.msra.mxu1 %v322_v8 }
  0x1c   :  { %290 = vmatprep.subr.bf16.mxu0 %v323_v9  ;;  %307 = vmatprep.subr.bf16.mxu1 %v323_v9 }
  0x1f   :  { %291 = vmatpush3.bf16.msra.mxu0 %v323_v9  ;;  %315 = vmatpush3.bf16.msra.mxu1 %v323_v9 }
  0x22   :  { %293 = vmatmul.mubr.bf16.vlgmr.msra.gmra.mrb[0].mxu0 %v326_v10  ;;  %297 = vmatmul.mubr.bf16.vlgmr.msra.gmra.mrb[0].mxu1 %v327_v11 }
  0xf5   :  { %v294_v13 = vpop.f32.mrb[0].mxu0  ;;  %v298_v14 = vpop.f32.mrb[0].mxu1 }
  0xf6   :  { %v161_v15 = vadd.f32 %v294_v13, %v243_v12  ;;  %v177_v16 = vadd.f32 %v298_v14, %v243_v12  ;;  %v152_v17 = vpop.f32.mrb[1].mxu0  ;;  %v168_v18 = vpop.f32.mrb[1].mxu1 }
  0xf7   :  { %v153_v19 = vadd.f32 %v243_v12, %v152_v17  ;;  %v169_v20 = vadd.f32 %v243_v12, %v168_v18  ;;  %v295_v21 = vpop.f32.mrb[2].mxu0  ;;  %v299_v22 = vpop.f32.mrb[2].mxu1 }
  0xf8   :  { %v258_v23 = vmul.f32 -1.442695, %v161_v15  ;;  %v262_v24 = vmul.f32 -1.442695, %v177_v16  ;;  %v164_v25 = vadd.f32 %v295_v21, %v243_v12  ;;  %v180_v26 = vadd.f32 %v299_v22, %v243_v12  ;;  %v155_v27 = vpop.f32.mrb[3].mxu0  ;;  %v171_v28 = vpop.f32.mrb[3].mxu1 }
  0xf9   :  { %v256_v29 = vmul.f32 -1.442695, %v153_v19  ;;  %v260_v30 = vmul.f32 -1.442695, %v169_v20  ;;  %v156_v31 = vadd.f32 %v243_v12, %v155_v27  ;;  %v172_v32 = vadd.f32 %v243_v12, %v171_v28 }
  0xfa   :  { %328 = vpow2.f32 %v258_v23  ;;  %v259_v33 = vmul.f32 -1.442695, %v164_v25  ;;  %v263_v34 = vmul.f32 -1.442695, %v180_v26 }
  0xfb   :  { %330 = vpow2.f32 %v262_v24  ;;  %v257_v35 = vmul.f32 -1.442695, %v156_v31  ;;  %v261_v36 = vmul.f32 -1.442695, %v172_v32 }
  0xfc   :  { %332 = vpow2.f32 %v256_v29 }
  0xfd   :  { %334 = vpow2.f32 %v260_v30 }
  0xfe   :  { %336 = vpow2.f32 %v259_v33 }
  0xff   :  { %338 = vpow2.f32 %v263_v34 }
 0x100   :  { %340 = vpow2.f32 %v257_v35 }
 0x101   :  { %342 = vpow2.f32 %v261_v36 }
 0x104   :  { %v329_v37 = vpop.eup %328 }
 0x105   :  { %v331_v38 = vpop.eup %330  ;;  %v209_v39 = vadd.f32 1.0, %v329_v37 }
 0x106   :  { %v333_v40 = vpop.eup %332  ;;  %v213_v41 = vadd.f32 1.0, %v331_v38 }
 0x107   :  { %v335_v42 = vpop.eup %334  ;;  %344 = vrcp.f32 %v209_v39  ;;  %v207_v43 = vadd.f32 1.0, %v333_v40 }
 0x108   :  { %v337_v44 = vpop.eup %336  ;;  %346 = vrcp.f32 %v213_v41  ;;  %v211_v45 = vadd.f32 1.0, %v335_v42 }
 0x109   :  { %v339_v46 = vpop.eup %338  ;;  %348 = vrcp.f32 %v207_v43  ;;  %v210_v47 = vadd.f32 1.0, %v337_v44 }
 0x10a   :  { %v341_v48 = vpop.eup %340  ;;  %350 = vrcp.f32 %v211_v45  ;;  %v214_v49 = vadd.f32 1.0, %v339_v46 }
 0x10b   :  { %v343_v50 = vpop.eup %342  ;;  %352 = vrcp.f32 %v210_v47  ;;  %v208_v51 = vadd.f32 1.0, %v341_v48 }
 0x10c   :  { %354 = vrcp.f32 %v214_v49  ;;  %v212_v52 = vadd.f32 1.0, %v343_v50 }
 0x10d   :  { %356 = vrcp.f32 %v208_v51 }
 0x10e   :  { %358 = vrcp.f32 %v212_v52 }
 0x111   :  { %v345_v53 = vpop.eup %344 }
 0x112   :  { %v347_v54 = vpop.eup %346  ;;  %233 = vst [vmem:[%s446_s3 + $0x10] sm:$0xff] %v345_v53 }
 0x113   :  { %v349_v55 = vpop.eup %348  ;;  %237 = vst [vmem:[%s446_s3 + $0x30] sm:$0xff] %v347_v54 }
 0x114   :  { %v351_v56 = vpop.eup %350  ;;  %231 = vst [vmem:[%s446_s3] sm:$0xff] %v349_v55 }
 0x115   :  { %v353_v57 = vpop.eup %352  ;;  %235 = vst [vmem:[%s446_s3 + $0x20] sm:$0xff] %v351_v56 }
 0x116   :  { %v355_v58 = vpop.eup %354  ;;  %234 = vst [vmem:[%s446_s3 + $0x18] sm:$0xff] %v353_v57 }
 0x117   :  { %v357_v59 = vpop.eup %356  ;;  %238 = vst [vmem:[%s446_s3 + $0x38] sm:$0xff] %v355_v58 }
 0x118   :  { %v359_v60 = vpop.eup %358  ;;  %232 = vst [vmem:[%s446_s3 + $0x8] sm:$0xff] %v357_v59 }
 0x119   :  { %236 = vst [vmem:[%s446_s3 + $0x28] sm:$0xff] %v359_v60 }

// kernel: rnn_forward.7
= control target key start
LH: loop header
LB: loop body
LE: loop exit
PB: predicated region body
PF: predicated region fallthrough
CT: control target
= control target key end

     0   :  { %v532_v1 = vmov 0   ;;  %v57_v37 = vlaneseq  ;;  %s808_s1 = inlined_call_operand.vmem [shape: bf16[128,512], index: 1, kind: input, shape index: {}]   ;;  %s809_s0 = inlined_call_operand.vmem [shape: bf16[64,128], index: 0, kind: input, shape index: {}]   ;;  %s810_s2 = inlined_call_operand.vmem [shape: f32[1,512], index: 2, kind: input, shape index: {}]   ;;  %s811_s3 = inlined_call_operand.vmem [shape: f32[64,512], index: 3, kind: output, shape index: {}]  }
   0x1   :  { %v480_v0 = vld [vmem:[%s808_s1 + $0x4] ss:$16 sps:$4 sm:$0xff]   ;;  %293 = vmatprep.mubr.bf16.mxu0 %v532_v1  ;;  %366 = vmatprep.mubr.bf16.mxu1 %v532_v1  ;;  %v482_v2 = vld [vmem:[%s808_s1 + $0xc] ss:$16 sps:$4 sm:$0xff]   ;;  %v484_v3 = vld [vmem:[%s808_s1] ss:$16 sps:$4 sm:$0xff]  }
   0x2   :  { %261 = vmatprep.subr.bf16.mxu0 %v480_v0  ;;  %v485_v4 = vld [vmem:[%s808_s1 + $0x8] ss:$16 sps:$4 sm:$0xff]   ;;  %334 = vmatprep.subr.bf16.mxu1 %v482_v2  ;;  %v486_v5 = vld [vmem:[%s808_s1 + $0x24] ss:$16 sps:$4 sm:$0xff]   ;;  %v488_v6 = vld [vmem:[%s808_s1 + $0x2c] ss:$16 sps:$4 sm:$0xff]  }
   0x3   :  { %262 = vmatpush1.bf16.msra.mxu0 %v484_v3  ;;  %335 = vmatpush1.bf16.msra.mxu1 %v485_v4  ;;  %v490_v7 = vld [vmem:[%s808_s1 + $0x20] ss:$16 sps:$4 sm:$0xff]   ;;  %v491_v8 = vld [vmem:[%s808_s1 + $0x28] ss:$16 sps:$4 sm:$0xff]   ;;  %v492_v9 = vld [vmem:[%s808_s1 + $0x44] ss:$16 sps:$4 sm:$0xff]  }
   0x4   :  { %263 = vmatprep.subr.bf16.mxu0 %v486_v5  ;;  %336 = vmatprep.subr.bf16.mxu1 %v488_v6  ;;  %v494_v10 = vld [vmem:[%s808_s1 + $0x4c] ss:$16 sps:$4 sm:$0xff]   ;;  %v496_v11 = vld [vmem:[%s808_s1 + $0x40] ss:$16 sps:$4 sm:$0xff]   ;;  %v497_v12 = vld [vmem:[%s808_s1 + $0x48] ss:$16 sps:$4 sm:$0xff]  }
   0x5   :  { %v498_v13 = vld [vmem:[%s808_s1 + $0x64] ss:$16 sps:$4 sm:$0xff]   ;;  %v500_v14 = vld [vmem:[%s808_s1 + $0x6c] ss:$16 sps:$4 sm:$0xff]   ;;  %v502_v15 = vld [vmem:[%s808_s1 + $0x60] ss:$16 sps:$4 sm:$0xff]  }
   0x6   :  { %v503_v16 = vld [vmem:[%s808_s1 + $0x68] ss:$16 sps:$4 sm:$0xff]   ;;  %v504_v17 = vld [vmem:[%s808_s1 + $0x84] ss:$16 sps:$4 sm:$0xff]   ;;  %v506_v18 = vld [vmem:[%s808_s1 + $0x8c] ss:$16 sps:$4 sm:$0xff]  }
   0x7   :  { %264 = vmatpush1.bf16.msra.mxu0 %v490_v7  ;;  %337 = vmatpush1.bf16.msra.mxu1 %v491_v8  ;;  %v508_v19 = vld [vmem:[%s808_s1 + $0x80] ss:$16 sps:$4 sm:$0xff]   ;;  %v509_v20 = vld [vmem:[%s808_s1 + $0x88] ss:$16 sps:$4 sm:$0xff]   ;;  %v510_v21 = vld [vmem:[%s808_s1 + $0xa4] ss:$16 sps:$4 sm:$0xff]  }
   0x8   :  { %265 = vmatprep.subr.bf16.mxu0 %v492_v9  ;;  %338 = vmatprep.subr.bf16.mxu1 %v494_v10  ;;  %v512_v22 = vld [vmem:[%s808_s1 + $0xac] ss:$16 sps:$4 sm:$0xff]   ;;  %v514_v23 = vld [vmem:[%s808_s1 + $0xa0] ss:$16 sps:$4 sm:$0xff]   ;;  %v515_v24 = vld [vmem:[%s808_s1 + $0xa8] ss:$16 sps:$4 sm:$0xff]  }
   0x9   :  { %v516_v25 = vld [vmem:[%s808_s1 + $0xc4] ss:$16 sps:$4 sm:$0xff]   ;;  %v518_v26 = vld [vmem:[%s808_s1 + $0xcc] ss:$16 sps:$4 sm:$0xff]   ;;  %v520_v27 = vld [vmem:[%s808_s1 + $0xc0] ss:$16 sps:$4 sm:$0xff]  }
   0xa   :  { %v521_v28 = vld [vmem:[%s808_s1 + $0xc8] ss:$16 sps:$4 sm:$0xff]   ;;  %v522_v29 = vld [vmem:[%s808_s1 + $0xe4] ss:$16 sps:$4 sm:$0xff]   ;;  %v524_v30 = vld [vmem:[%s808_s1 + $0xec] ss:$16 sps:$4 sm:$0xff]  }
   0xb   :  { %266 = vmatpush1.bf16.msra.mxu0 %v496_v11  ;;  %339 = vmatpush1.bf16.msra.mxu1 %v497_v12  ;;  %v526_v31 = vld [vmem:[%s808_s1 + $0xe0] ss:$16 sps:$4 sm:$0xff]   ;;  %v527_v32 = vld [vmem:[%s808_s1 + $0xe8] ss:$16 sps:$4 sm:$0xff]   ;;  %v58_v38 = vshrl.u32 %v57_v37, 7 }
   0xc   :  { %267 = vmatprep.subr.bf16.mxu0 %v498_v13  ;;  %340 = vmatprep.subr.bf16.mxu1 %v500_v14  ;;  %v528_v33 = vld [vmem:[%s809_s0] sm:$0xff]   ;;  %v529_v34 = vld [vmem:[%s809_s0 + $0x8] sm:$0xff]   ;;  %v530_v35 = vld [vmem:[%s809_s0 + $0x10] sm:$0xff]  }
   0xd   :  { %v531_v36 = vld [vmem:[%s809_s0 + $0x18] sm:$0xff]   ;;  %v59_v39 = vsub.s32 0, %v58_v38  ;;  %v67_v40 = vsub.s32 2, %v58_v38  ;;  %v55_v41 = vld [vmem:[%s810_s2] sm:$0xf]  ;;  %v63_v42 = vsub.s32 1, %v58_v38 }
   0xe   :  { %v71_v43 = vsub.s32 3, %v58_v38 }
   0xf   :  { %268 = vmatpush1.bf16.msra.mxu0 %v502_v15  ;;  %341 = vmatpush1.bf16.msra.mxu1 %v503_v16  ;;  %v672_v44 = vrot.slane %v55_v41, %v59_v39  ;;  %v674_v45 = vrot.slane %v55_v41, %v67_v40  ;;  %v676_v46 = vrot.slane %v55_v41, %v63_v42 }
  0x10   :  { %269 = vmatprep.subr.bf16.mxu0 %v504_v17  ;;  %342 = vmatprep.subr.bf16.mxu1 %v506_v18  ;;  %v678_v47 = vrot.slane %v55_v41, %v71_v43 }
  0x13   :  { %270 = vmatpush1.bf16.msra.mxu0 %v508_v19  ;;  %343 = vmatpush1.bf16.msra.mxu1 %v509_v20 }
  0x14   :  { %271 = vmatprep.subr.bf16.mxu0 %v510_v21  ;;  %344 = vmatprep.subr.bf16.mxu1 %v512_v22 }
  0x17   :  { %272 = vmatpush1.bf16.msra.mxu0 %v514_v23  ;;  %345 = vmatpush1.bf16.msra.mxu1 %v515_v24 }
  0x18   :  { %273 = vmatprep.subr.bf16.mxu0 %v516_v25  ;;  %346 = vmatprep.subr.bf16.mxu1 %v518_v26 }
  0x1b   :  { %274 = vmatpush1.bf16.msra.mxu0 %v520_v27  ;;  %347 = vmatpush1.bf16.msra.mxu1 %v521_v28 }
  0x1c   :  { %275 = vmatprep.subr.bf16.mxu0 %v522_v29  ;;  %348 = vmatprep.subr.bf16.mxu1 %v524_v30 }
  0x1f   :  { %276 = vmatpush1.bf16.msra.mxu0 %v526_v31  ;;  %349 = vmatpush1.bf16.msra.mxu1 %v527_v32 }
  0x22   :  { %294 = vmatmul.mubr.bf16.vlgmr.msra.gmra.mrb[0].mxu0 %v528_v33  ;;  %367 = vmatmul.mubr.bf16.vlgmr.msra.gmra.mrb[0].mxu1 %v528_v33 }
  0x23   :  { %303 = vmatprep.mubr.bf16.mxu0 %v532_v1  ;;  %376 = vmatprep.mubr.bf16.mxu1 %v532_v1 }
  0x2a   :  { %304 = vmatmul.mubr.bf16.gmra.mrb[4].mxu0 %v529_v34  ;;  %377 = vmatmul.mubr.bf16.gmra.mrb[4].mxu1 %v529_v34 }
  0x2b   :  { %313 = vmatprep.mubr.bf16.mxu0 %v532_v1  ;;  %386 = vmatprep.mubr.bf16.mxu1 %v532_v1 }
  0x32   :  { %314 = vmatmul.mubr.bf16.gmra.mrb[8].mxu0 %v530_v35  ;;  %387 = vmatmul.mubr.bf16.gmra.mrb[8].mxu1 %v530_v35 }
  0x33   :  { %323 = vmatprep.mubr.bf16.mxu0 %v532_v1  ;;  %396 = vmatprep.mubr.bf16.mxu1 %v532_v1 }
  0x3a   :  { %324 = vmatmul.mubr.bf16.gmra.mrb[12].mxu0 %v531_v36  ;;  %397 = vmatmul.mubr.bf16.gmra.mrb[12].mxu1 %v531_v36 }
  0xf5   :  { %v295_v48 = vpop.f32.mrb[0].mxu0  ;;  %v368_v49 = vpop.f32.mrb[0].mxu1 }
  0xf6   :  { %v296_v50 = vadd.f32 %v295_v48, %v672_v44  ;;  %v369_v51 = vadd.f32 %v368_v49, %v674_v45  ;;  %v297_v52 = vpop.f32.mrb[1].mxu0  ;;  %v370_v53 = vpop.f32.mrb[1].mxu1 }
  0xf7   :  { %v298_v54 = vadd.f32 %v297_v52, %v676_v46  ;;  %v371_v55 = vadd.f32 %v370_v53, %v678_v47  ;;  %v299_v56 = vpop.f32.mrb[2].mxu0  ;;  %v372_v57 = vpop.f32.mrb[2].mxu1 }
  0xf8   :  { %407 = vst [vmem:[%s811_s3] sm:$0xff] %v296_v50  ;;  %409 = vst [vmem:[%s811_s3 + $0x10] sm:$0xff] %v369_v51  ;;  %v300_v58 = vadd.f32 %v299_v56, %v672_v44  ;;  %v373_v59 = vadd.f32 %v372_v57, %v674_v45  ;;  %v301_v60 = vpop.f32.mrb[3].mxu0  ;;  %v374_v61 = vpop.f32.mrb[3].mxu1 }
  0xf9   :  { %408 = vst [vmem:[%s811_s3 + $0x8] sm:$0xff] %v298_v54  ;;  %410 = vst [vmem:[%s811_s3 + $0x18] sm:$0xff] %v371_v55  ;;  %v302_v62 = vadd.f32 %v301_v60, %v676_v46  ;;  %v375_v63 = vadd.f32 %v374_v61, %v678_v47 }
  0xfa   :  { %411 = vst [vmem:[%s811_s3 + $0x20] sm:$0xff] %v300_v58  ;;  %413 = vst [vmem:[%s811_s3 + $0x30] sm:$0xff] %v373_v59 }
  0xfb   :  { %412 = vst [vmem:[%s811_s3 + $0x28] sm:$0xff] %v302_v62  ;;  %414 = vst [vmem:[%s811_s3 + $0x38] sm:$0xff] %v375_v63 }
  0xfd   :  { %v305_v0 = vpop.f32.mrb[4].mxu0  ;;  %v378_v1 = vpop.f32.mrb[4].mxu1 }
  0xfe   :  { %v306_v2 = vadd.f32 %v305_v0, %v672_v44  ;;  %v379_v3 = vadd.f32 %v378_v1, %v674_v45  ;;  %v307_v4 = vpop.f32.mrb[5].mxu0  ;;  %v380_v5 = vpop.f32.mrb[5].mxu1 }
  0xff   :  { %v308_v6 = vadd.f32 %v307_v4, %v676_v46  ;;  %v381_v7 = vadd.f32 %v380_v5, %v678_v47  ;;  %v309_v8 = vpop.f32.mrb[6].mxu0  ;;  %v382_v9 = vpop.f32.mrb[6].mxu1 }
 0x100   :  { %415 = vst [vmem:[%s811_s3 + $0x40] sm:$0xff] %v306_v2  ;;  %417 = vst [vmem:[%s811_s3 + $0x50] sm:$0xff] %v379_v3  ;;  %v310_v10 = vadd.f32 %v309_v8, %v672_v44  ;;  %v383_v11 = vadd.f32 %v382_v9, %v674_v45  ;;  %v311_v12 = vpop.f32.mrb[7].mxu0  ;;  %v384_v13 = vpop.f32.mrb[7].mxu1 }
 0x101   :  { %416 = vst [vmem:[%s811_s3 + $0x48] sm:$0xff] %v308_v6  ;;  %418 = vst [vmem:[%s811_s3 + $0x58] sm:$0xff] %v381_v7  ;;  %v312_v14 = vadd.f32 %v311_v12, %v676_v46  ;;  %v385_v15 = vadd.f32 %v384_v13, %v678_v47 }
 0x102   :  { %419 = vst [vmem:[%s811_s3 + $0x60] sm:$0xff] %v310_v10  ;;  %421 = vst [vmem:[%s811_s3 + $0x70] sm:$0xff] %v383_v11 }
 0x103   :  { %420 = vst [vmem:[%s811_s3 + $0x68] sm:$0xff] %v312_v14  ;;  %422 = vst [vmem:[%s811_s3 + $0x78] sm:$0xff] %v385_v15 }
 0x105   :  { %v315_v16 = vpop.f32.mrb[8].mxu0  ;;  %v388_v17 = vpop.f32.mrb[8].mxu1 }
 0x106   :  { %v316_v18 = vadd.f32 %v315_v16, %v672_v44  ;;  %v389_v19 = vadd.f32 %v388_v17, %v674_v45  ;;  %v317_v20 = vpop.f32.mrb[9].mxu0  ;;  %v390_v21 = vpop.f32.mrb[9].mxu1 }
 0x107   :  { %v318_v22 = vadd.f32 %v317_v20, %v676_v46  ;;  %v391_v23 = vadd.f32 %v390_v21, %v678_v47  ;;  %v319_v24 = vpop.f32.mrb[10].mxu0  ;;  %v392_v25 = vpop.f32.mrb[10].mxu1 }
 0x108   :  { %423 = vst [vmem:[%s811_s3 + $0x80] sm:$0xff] %v316_v18  ;;  %425 = vst [vmem:[%s811_s3 + $0x90] sm:$0xff] %v389_v19  ;;  %v320_v26 = vadd.f32 %v319_v24, %v672_v44  ;;  %v393_v27 = vadd.f32 %v392_v25, %v674_v45  ;;  %v321_v28 = vpop.f32.mrb[11].mxu0  ;;  %v394_v29 = vpop.f32.mrb[11].mxu1 }
 0x109   :  { %424 = vst [vmem:[%s811_s3 + $0x88] sm:$0xff] %v318_v22  ;;  %426 = vst [vmem:[%s811_s3 + $0x98] sm:$0xff] %v391_v23  ;;  %v322_v30 = vadd.f32 %v321_v28, %v676_v46  ;;  %v395_v31 = vadd.f32 %v394_v29, %v678_v47 }
 0x10a   :  { %427 = vst [vmem:[%s811_s3 + $0xa0] sm:$0xff] %v320_v26  ;;  %429 = vst [vmem:[%s811_s3 + $0xb0] sm:$0xff] %v393_v27 }
 0x10b   :  { %428 = vst [vmem:[%s811_s3 + $0xa8] sm:$0xff] %v322_v30  ;;  %430 = vst [vmem:[%s811_s3 + $0xb8] sm:$0xff] %v395_v31 }
 0x10d   :  { %v325_v32 = vpop.f32.mrb[12].mxu0  ;;  %v398_v33 = vpop.f32.mrb[12].mxu1 }
 0x10e   :  { %v326_v34 = vadd.f32 %v325_v32, %v672_v44  ;;  %v399_v35 = vadd.f32 %v398_v33, %v674_v45  ;;  %v327_v36 = vpop.f32.mrb[13].mxu0  ;;  %v400_v37 = vpop.f32.mrb[13].mxu1 }
 0x10f   :  { %v328_v38 = vadd.f32 %v327_v36, %v676_v46  ;;  %v401_v39 = vadd.f32 %v400_v37, %v678_v47  ;;  %v329_v40 = vpop.f32.mrb[14].mxu0  ;;  %v402_v41 = vpop.f32.mrb[14].mxu1 }
 0x110   :  { %431 = vst [vmem:[%s811_s3 + $0xc0] sm:$0xff] %v326_v34  ;;  %433 = vst [vmem:[%s811_s3 + $0xd0] sm:$0xff] %v399_v35  ;;  %v330_v42 = vadd.f32 %v329_v40, %v672_v44  ;;  %v403_v43 = vadd.f32 %v402_v41, %v674_v45  ;;  %v331_v48 = vpop.f32.mrb[15].mxu0  ;;  %v404_v49 = vpop.f32.mrb[15].mxu1 }
 0x111   :  { %432 = vst [vmem:[%s811_s3 + $0xc8] sm:$0xff] %v328_v38  ;;  %434 = vst [vmem:[%s811_s3 + $0xd8] sm:$0xff] %v401_v39  ;;  %v332_v50 = vadd.f32 %v331_v48, %v676_v46  ;;  %v405_v51 = vadd.f32 %v404_v49, %v678_v47 }
 0x112   :  { %435 = vst [vmem:[%s811_s3 + $0xe0] sm:$0xff] %v330_v42  ;;  %437 = vst [vmem:[%s811_s3 + $0xf0] sm:$0xff] %v403_v43 }
 0x113   :  { %436 = vst [vmem:[%s811_s3 + $0xe8] sm:$0xff] %v332_v50  ;;  %438 = vst [vmem:[%s811_s3 + $0xf8] sm:$0xff] %v405_v51 }

// kernel: rnn_forward.6
= control target key start
LH: loop header
LB: loop body
LE: loop exit
PB: predicated region body
PF: predicated region fallthrough
CT: control target
= control target key end

     0   :  { %v3081_v1 = vmov 0   ;;  %v3082_v33 = vmov 0.0|0.0   ;;  %s3834_s1 = inlined_call_operand.vmem [shape: bf16[128,512], index: 1, kind: input, shape index: {}]   ;;  %s3835_s0 = inlined_call_operand.vmem [shape: f32[8,8,512], index: 0, kind: input, shape index: {}]   ;;  %s3836_s2 = inlined_call_operand.vmem [shape: bf16[8,8,128], index: 2, kind: output, shape index: {}]  }
   0x1   :  { %v3101_v0 = vld [vmem:[%s3834_s1 + $0x4] ss:$16 sps:$4 sm:$0xff]   ;;  %248 = vmatprep.mubr.bf16.mxu0 %v3081_v1  ;;  %289 = vmatprep.mubr.bf16.mxu1 %v3081_v1  ;;  %v3108_v2 = vld [vmem:[%s3834_s1] ss:$16 sps:$4 sm:$0xff]   ;;  %v3131_v6 = vld [vmem:[%s3834_s1 + $0xc] ss:$16 sps:$4 sm:$0xff]  }
   0x2   :  { %216 = vmatprep.subr.bf16.mxu0 %v3101_v0  ;;  %v3114_v3 = vld [vmem:[%s3834_s1 + $0x24] ss:$16 sps:$4 sm:$0xff]   ;;  %v3120_v4 = vld [vmem:[%s3834_s1 + $0x20] ss:$16 sps:$4 sm:$0xff]   ;;  %v3136_v7 = vld [vmem:[%s3834_s1 + $0x8] ss:$16 sps:$4 sm:$0xff]   ;;  %257 = vmatprep.subr.bf16.mxu1 %v3131_v6 }
   0x3   :  { %217 = vmatpush1.bf16.msra.mxu0 %v3108_v2  ;;  %v3126_v5 = vld [vmem:[%s3834_s1 + $0x44] ss:$16 sps:$4 sm:$0xff]   ;;  %v3142_v8 = vld [vmem:[%s3834_s1 + $0x40] ss:$16 sps:$4 sm:$0xff]   ;;  %258 = vmatpush1.bf16.msra.mxu1 %v3136_v7  ;;  %v3155_v10 = vld [vmem:[%s3834_s1 + $0x2c] ss:$16 sps:$4 sm:$0xff]  }
   0x4   :  { %218 = vmatprep.subr.bf16.mxu0 %v3114_v3  ;;  %v3149_v9 = vld [vmem:[%s3834_s1 + $0x64] ss:$16 sps:$4 sm:$0xff]   ;;  %v3160_v11 = vld [vmem:[%s3834_s1 + $0x28] ss:$16 sps:$4 sm:$0xff]   ;;  %259 = vmatprep.subr.bf16.mxu1 %v3155_v10  ;;  %v3167_v12 = vld [vmem:[%s3834_s1 + $0x60] ss:$16 sps:$4 sm:$0xff]  }
   0x5   :  { %v3172_v13 = vld [vmem:[%s3834_s1 + $0x84] ss:$16 sps:$4 sm:$0xff]   ;;  %v3177_v14 = vld [vmem:[%s3834_s1 + $0x4c] ss:$16 sps:$4 sm:$0xff]   ;;  %v3184_v15 = vld [vmem:[%s3834_s1 + $0x48] ss:$16 sps:$4 sm:$0xff]  }
   0x6   :  { %v3190_v16 = vld [vmem:[%s3834_s1 + $0x6c] ss:$16 sps:$4 sm:$0xff]   ;;  %v3196_v17 = vld [vmem:[%s3834_s1 + $0x80] ss:$16 sps:$4 sm:$0xff]   ;;  %v3202_v18 = vld [vmem:[%s3834_s1 + $0xa4] ss:$16 sps:$4 sm:$0xff]  }
   0x7   :  { %219 = vmatpush1.bf16.msra.mxu0 %v3120_v4  ;;  %260 = vmatpush1.bf16.msra.mxu1 %v3160_v11  ;;  %v3208_v19 = vld [vmem:[%s3834_s1 + $0x68] ss:$16 sps:$4 sm:$0xff]   ;;  %v3214_v20 = vld [vmem:[%s3834_s1 + $0x8c] ss:$16 sps:$4 sm:$0xff]   ;;  %v3220_v21 = vld [vmem:[%s3834_s1 + $0xa0] ss:$16 sps:$4 sm:$0xff]  }
   0x8   :  { %220 = vmatprep.subr.bf16.mxu0 %v3126_v5  ;;  %261 = vmatprep.subr.bf16.mxu1 %v3177_v14  ;;  %v3225_v22 = vld [vmem:[%s3834_s1 + $0xc4] ss:$16 sps:$4 sm:$0xff]   ;;  %v3232_v23 = vld [vmem:[%s3834_s1 + $0x88] ss:$16 sps:$4 sm:$0xff]   ;;  %v3237_v24 = vld [vmem:[%s3834_s1 + $0xc0] ss:$16 sps:$4 sm:$0xff]  }
   0x9   :  { %v3243_v25 = vld [vmem:[%s3834_s1 + $0xac] ss:$16 sps:$4 sm:$0xff]   ;;  %v3248_v26 = vld [vmem:[%s3834_s1 + $0xe4] ss:$16 sps:$4 sm:$0xff]   ;;  %v3253_v27 = vld [vmem:[%s3834_s1 + $0xa8] ss:$16 sps:$4 sm:$0xff]  }
   0xa   :  { %v3259_v28 = vld [vmem:[%s3834_s1 + $0xcc] ss:$16 sps:$4 sm:$0xff]   ;;  %v3266_v29 = vld [vmem:[%s3834_s1 + $0xe0] ss:$16 sps:$4 sm:$0xff]   ;;  %v3272_v30 = vld [vmem:[%s3834_s1 + $0xc8] ss:$16 sps:$4 sm:$0xff]  }
   0xb   :  { %221 = vmatpush1.bf16.msra.mxu0 %v3142_v8  ;;  %262 = vmatpush1.bf16.msra.mxu1 %v3184_v15  ;;  %v3278_v31 = vld [vmem:[%s3834_s1 + $0xec] ss:$16 sps:$4 sm:$0xff]   ;;  %v3288_v32 = vld [vmem:[%s3834_s1 + $0xe8] ss:$16 sps:$4 sm:$0xff]   ;;  %v18_v34 = vld [vmem:[%s3835_s0] sm:$0xff] }
   0xc   :  { %222 = vmatprep.subr.bf16.mxu0 %v3149_v9  ;;  %263 = vmatprep.subr.bf16.mxu1 %v3190_v16  ;;  %v19_v35 = vld [vmem:[%s3835_s0 + $0x8] sm:$0xff]  ;;  %v21_v44 = vld [vmem:[%s3835_s0 + $0x18] sm:$0xff]  ;;  %v20_v50 = vld [vmem:[%s3835_s0 + $0x10] sm:$0xff] }
   0xf   :  { %223 = vmatpush1.bf16.msra.mxu0 %v3167_v12  ;;  %264 = vmatpush1.bf16.msra.mxu1 %v3208_v19 }
  0x10   :  { %224 = vmatprep.subr.bf16.mxu0 %v3172_v13  ;;  %265 = vmatprep.subr.bf16.mxu1 %v3214_v20 }
  0x13   :  { %225 = vmatpush1.bf16.msra.mxu0 %v3196_v17  ;;  %266 = vmatpush1.bf16.msra.mxu1 %v3232_v23 }
  0x14   :  { %226 = vmatprep.subr.bf16.mxu0 %v3202_v18  ;;  %267 = vmatprep.subr.bf16.mxu1 %v3243_v25 }
  0x17   :  { %227 = vmatpush1.bf16.msra.mxu0 %v3220_v21  ;;  %268 = vmatpush1.bf16.msra.mxu1 %v3253_v27 }
  0x18   :  { %228 = vmatprep.subr.bf16.mxu0 %v3225_v22  ;;  %269 = vmatprep.subr.bf16.mxu1 %v3259_v28 }
  0x1b   :  { %229 = vmatpush1.bf16.msra.mxu0 %v3237_v24  ;;  %270 = vmatpush1.bf16.msra.mxu1 %v3272_v30 }
  0x1c   :  { %230 = vmatprep.subr.bf16.mxu0 %v3248_v26  ;;  %271 = vmatprep.subr.bf16.mxu1 %v3278_v31 }
  0x1f   :  { %231 = vmatpush1.bf16.msra.mxu0 %v3266_v29  ;;  %272 = vmatpush1.bf16.msra.mxu1 %v3288_v32 }
  0x20   :  { %530 = vmatprep.subr.bf16.mxu0 %v3101_v0  ;;  %571 = vmatprep.subr.bf16.mxu1 %v3131_v6 }
  0x22   :  { %249 = vmatmul.mubr.bf16.vlgmr.msra.gmra.mrb[0].mxu0 %v3082_v33  ;;  %290 = vmatmul.mubr.bf16.vlgmr.msra.gmra.mrb[0].mxu1 %v3082_v33 }
  0x23   :  { %531 = vmatpush1.bf16.msra.mxu0 %v3108_v2  ;;  %562 = vmatprep.mubr.bf16.mxu0 %v3081_v1 }
  0x24   :  { %532 = vmatprep.subr.bf16.mxu0 %v3114_v3  ;;  %572 = vmatpush1.bf16.msra.mxu1 %v3136_v7 }
  0x25   :  { %573 = vmatprep.subr.bf16.mxu1 %v3155_v10  ;;  %603 = vmatprep.mubr.bf16.mxu1 %v3081_v1 }
  0x27   :  { %533 = vmatpush1.bf16.msra.mxu0 %v3120_v4 }
  0x28   :  { %534 = vmatprep.subr.bf16.mxu0 %v3126_v5  ;;  %574 = vmatpush1.bf16.msra.mxu1 %v3160_v11 }
  0x29   :  { %575 = vmatprep.subr.bf16.mxu1 %v3177_v14 }
  0x2b   :  { %535 = vmatpush1.bf16.msra.mxu0 %v3142_v8 }
  0x2c   :  { %536 = vmatprep.subr.bf16.mxu0 %v3149_v9  ;;  %576 = vmatpush1.bf16.msra.mxu1 %v3184_v15 }
  0x2d   :  { %577 = vmatprep.subr.bf16.mxu1 %v3190_v16 }
  0x2f   :  { %537 = vmatpush1.bf16.msra.mxu0 %v3167_v12 }
  0x30   :  { %538 = vmatprep.subr.bf16.mxu0 %v3172_v13  ;;  %578 = vmatpush1.bf16.msra.mxu1 %v3208_v19 }
  0x31   :  { %579 = vmatprep.subr.bf16.mxu1 %v3214_v20 }
  0x33   :  { %539 = vmatpush1.bf16.msra.mxu0 %v3196_v17 }
  0x34   :  { %540 = vmatprep.subr.bf16.mxu0 %v3202_v18  ;;  %580 = vmatpush1.bf16.msra.mxu1 %v3232_v23 }
  0x35   :  { %581 = vmatprep.subr.bf16.mxu1 %v3243_v25 }
  0x37   :  { %541 = vmatpush1.bf16.msra.mxu0 %v3220_v21 }
  0x38   :  { %542 = vmatprep.subr.bf16.mxu0 %v3225_v22  ;;  %582 = vmatpush1.bf16.msra.mxu1 %v3253_v27 }
  0x39   :  { %583 = vmatprep.subr.bf16.mxu1 %v3259_v28 }
  0x3b   :  { %543 = vmatpush1.bf16.msra.mxu0 %v3237_v24 }
  0x3c   :  { %544 = vmatprep.subr.bf16.mxu0 %v3248_v26  ;;  %584 = vmatpush1.bf16.msra.mxu1 %v3272_v30 }
  0x3d   :  { %585 = vmatprep.subr.bf16.mxu1 %v3278_v31 }
  0x3f   :  { %545 = vmatpush1.bf16.msra.mxu0 %v3266_v29 }
  0x40   :  { %845 = vmatprep.subr.bf16.mxu0 %v3101_v0  ;;  %586 = vmatpush1.bf16.msra.mxu1 %v3288_v32 }
  0x41   :  { %886 = vmatprep.subr.bf16.mxu1 %v3131_v6 }
  0xf5   :  { %v250_v36 = vpop.f32.mrb[0].mxu0  ;;  %v291_v45 = vpop.f32.mrb[0].mxu1 }
  0xf6   :  { %v298_v37 = vadd.f32 %v250_v36, %v18_v34  ;;  %v252_v38 = vpop.f32.mrb[1].mxu0  ;;  %v293_v46 = vpop.f32.mrb[1].mxu1  ;;  %v300_v52 = vadd.f32 %v291_v45, %v20_v50  ;;  %v2578_v50 = vld [vmem:[%s3835_s0 + $0x38] sm:$0xff] }
  0xf7   :  { %v299_v39 = vadd.f32 %v252_v38, %v19_v35  ;;  %v254_v40 = vpop.f32.mrb[2].mxu0  ;;  %v301_v47 = vadd.f32 %v293_v46, %v21_v44  ;;  %v295_v48 = vpop.f32.mrb[2].mxu1  ;;  %v2575_v38 = vld [vmem:[%s3835_s0 + $0x20] sm:$0xff] }
  0xf8   :  { %v2572_v41 = vmul.f32 -1.442695, %v298_v37  ;;  %v255_v42 = vpop.f32.mrb[3].mxu0  ;;  %v296_v49 = vpop.f32.mrb[3].mxu1 }
  0xf9   :  { %v2573_v43 = vmul.f32 -1.442695, %v299_v39  ;;  %v2574_v51 = vmul.f32 -1.442695, %v301_v47  ;;  %v2576_v39 = vld [vmem:[%s3835_s0 + $0x28] sm:$0xff] }
  0xfa   :  { %2953 = vpow2.f32 %v2572_v41 }
  0xfb   :  { %2955 = vpow2.f32 %v2573_v43 }
  0xfc   :  { %2957 = vpow2.f32 %v2574_v51 }
  0xfd   :  { %2959 = vtanh.f32 %v300_v52  ;;  %v2577_v52 = vld [vmem:[%s3835_s0 + $0x30] sm:$0xff] }
 0x104   :  { %v2954_v53 = vpop.eup %2953 }
 0x105   :  { %v2956_v54 = vpop.eup %2955  ;;  %v305_v55 = vadd.f32 1.0, %v2954_v53 }
 0x106   :  { %v311_v56 = vadd.f32 1.0, %v2956_v54  ;;  %v2958_v57 = vpop.eup %2957 }
 0x107   :  { %2961 = vrcp.f32 %v305_v55  ;;  %v2960_v58 = vpop.eup %2959  ;;  %v318_v60 = vadd.f32 1.0, %v2958_v57 }
 0x108   :  { %2963 = vrcp.f32 %v311_v56 }
 0x109   :  { %2965 = vrcp.f32 %v318_v60 }
 0x111   :  { %v2962_v59 = vpop.eup %2961 }
 0x112   :  { %v2964_v61 = vpop.eup %2963  ;;  %v323_v62 = vmul.f32 %v2962_v59, %v2960_v58 }
 0x113   :  { %v322_v63 = vmul.f32 0.0, %v2964_v61  ;;  %v2966_v34 = vpop.eup %2965 }
 0x115   :  { %v3340_v33 = vadd.f32 %v323_v62, %v322_v63 }
 0x117   :  { %2967 = vtanh.f32 %v3340_v33 }
 0x121   :  { %v2968_v35 = vpop.eup %2967 }
 0x122   :  { %v326_v36 = vmul.f32 %v2968_v35, %v2966_v34 }
 0x124   :  { %v329_v37 = vpack.c.bf16 %v326_v36, %v326_v36 }
 0x126   :  { %330 = vst [vmem:[%s3836_s2] sm:$0xf] %v329_v37  ;;  %563 = vmatmul.mubr.bf16.vlgmr.msra.gmra.mrb[4].mxu0 %v329_v37  ;;  %604 = vmatmul.mubr.bf16.vlgmr.msra.gmra.mrb[4].mxu1 %v329_v37 }
 0x127   :  { %846 = vmatpush1.bf16.msra.mxu0 %v3108_v2  ;;  %887 = vmatpush1.bf16.msra.mxu1 %v3136_v7 }
 0x128   :  { %847 = vmatprep.subr.bf16.mxu0 %v3114_v3  ;;  %888 = vmatprep.subr.bf16.mxu1 %v3155_v10 }
 0x129   :  { %877 = vmatprep.mubr.bf16.mxu0 %v3081_v1  ;;  %918 = vmatprep.mubr.bf16.mxu1 %v3081_v1 }
 0x12b   :  { %848 = vmatpush1.bf16.msra.mxu0 %v3120_v4  ;;  %889 = vmatpush1.bf16.msra.mxu1 %v3160_v11 }
 0x12c   :  { %849 = vmatprep.subr.bf16.mxu0 %v3126_v5  ;;  %890 = vmatprep.subr.bf16.mxu1 %v3177_v14 }
 0x12f   :  { %850 = vmatpush1.bf16.msra.mxu0 %v3142_v8  ;;  %891 = vmatpush1.bf16.msra.mxu1 %v3184_v15 }
 0x130   :  { %851 = vmatprep.subr.bf16.mxu0 %v3149_v9  ;;  %892 = vmatprep.subr.bf16.mxu1 %v3190_v16 }
 0x133   :  { %852 = vmatpush1.bf16.msra.mxu0 %v3167_v12  ;;  %893 = vmatpush1.bf16.msra.mxu1 %v3208_v19 }
 0x134   :  { %853 = vmatprep.subr.bf16.mxu0 %v3172_v13  ;;  %894 = vmatprep.subr.bf16.mxu1 %v3214_v20 }
 0x137   :  { %854 = vmatpush1.bf16.msra.mxu0 %v3196_v17  ;;  %895 = vmatpush1.bf16.msra.mxu1 %v3232_v23 }
 0x138   :  { %855 = vmatprep.subr.bf16.mxu0 %v3202_v18  ;;  %896 = vmatprep.subr.bf16.mxu1 %v3243_v25 }
 0x13b   :  { %856 = vmatpush1.bf16.msra.mxu0 %v3220_v21  ;;  %897 = vmatpush1.bf16.msra.mxu1 %v3253_v27 }
 0x13c   :  { %857 = vmatprep.subr.bf16.mxu0 %v3225_v22  ;;  %898 = vmatprep.subr.bf16.mxu1 %v3259_v28 }
 0x13f   :  { %858 = vmatpush1.bf16.msra.mxu0 %v3237_v24  ;;  %899 = vmatpush1.bf16.msra.mxu1 %v3272_v30 }
 0x140   :  { %859 = vmatprep.subr.bf16.mxu0 %v3248_v26  ;;  %900 = vmatprep.subr.bf16.mxu1 %v3278_v31 }
 0x143   :  { %860 = vmatpush1.bf16.msra.mxu0 %v3266_v29  ;;  %901 = vmatpush1.bf16.msra.mxu1 %v3288_v32 }
 0x144   :  { %1160 = vmatprep.subr.bf16.mxu0 %v3101_v0  ;;  %1201 = vmatprep.subr.bf16.mxu1 %v3131_v6 }
 0x1f9   :  { %v564_v40 = vpop.f32.mrb[4].mxu0  ;;  %v605_v41 = vpop.f32.mrb[4].mxu1 }
 0x1fa   :  { %v612_v42 = vadd.f32 %v2575_v38, %v564_v40  ;;  %v566_v43 = vpop.f32.mrb[5].mxu0  ;;  %v607_v44 = vpop.f32.mrb[5].mxu1  ;;  %v614_v54 = vadd.f32 %v2577_v52, %v605_v41  ;;  %v3508_v52 = vld [vmem:[%s3834_s1 + $0x4c] ss:$16 sps:$4 sm:$0xff]  }
 0x1fb   :  { %v613_v45 = vadd.f32 %v2576_v39, %v566_v43  ;;  %v568_v46 = vpop.f32.mrb[6].mxu0  ;;  %v609_v47 = vpop.f32.mrb[6].mxu1  ;;  %v615_v51 = vadd.f32 %v2578_v50, %v607_v44  ;;  %v3494_v50 = vld [vmem:[%s3834_s1 + $0x28] ss:$16 sps:$4 sm:$0xff]  }
 0x1fc   :  { %v2611_v48 = vmul.f32 -1.442695, %v612_v42  ;;  %v569_v0 = vpop.f32.mrb[7].mxu0  ;;  %v610_v49 = vpop.f32.mrb[7].mxu1  ;;  %v3460_v46 = vld [vmem:[%s3834_s1 + $0xc] ss:$16 sps:$4 sm:$0xff]  }
 0x1fd   :  { %v2612_v6 = vmul.f32 -1.442695, %v613_v45  ;;  %v2613_v53 = vmul.f32 -1.442695, %v615_v51  ;;  %v3455_v45 = vld [vmem:[%s3834_s1 + $0x4] ss:$16 sps:$4 sm:$0xff]  }
 0x1fe   :  { %2969 = vpow2.f32 %v2611_v48  ;;  %v3465_v47 = vld [vmem:[%s3834_s1] ss:$16 sps:$4 sm:$0xff]   ;;  %v3470_v48 = vld [vmem:[%s3834_s1 + $0x8] ss:$16 sps:$4 sm:$0xff]   ;;  %v3479_v0 = vld [vmem:[%s3834_s1 + $0x24] ss:$16 sps:$4 sm:$0xff]  }
 0x1ff   :  { %2971 = vpow2.f32 %v2612_v6  ;;  %v3484_v49 = vld [vmem:[%s3834_s1 + $0x2c] ss:$16 sps:$4 sm:$0xff]   ;;  %v3489_v6 = vld [vmem:[%s3834_s1 + $0x20] ss:$16 sps:$4 sm:$0xff]   ;;  %v3503_v51 = vld [vmem:[%s3834_s1 + $0x44] ss:$16 sps:$4 sm:$0xff]  }
 0x200   :  { %2973 = vpow2.f32 %v2613_v53  ;;  %v3513_v53 = vld [vmem:[%s3834_s1 + $0x40] ss:$16 sps:$4 sm:$0xff]  }
 0x201   :  { %2975 = vtanh.f32 %v614_v54  ;;  %v3518_v54 = vld [vmem:[%s3834_s1 + $0x48] ss:$16 sps:$4 sm:$0xff]  }
 0x208   :  { %v2970_v55 = vpop.eup %2969 }
 0x209   :  { %v2972_v56 = vpop.eup %2971  ;;  %v619_v57 = vadd.f32 1.0, %v2970_v55  ;;  %v3527_v55 = vld [vmem:[%s3834_s1 + $0x64] ss:$16 sps:$4 sm:$0xff]  }
 0x20a   :  { %v625_v58 = vadd.f32 1.0, %v2972_v56  ;;  %v2974_v59 = vpop.eup %2973  ;;  %v3532_v56 = vld [vmem:[%s3834_s1 + $0x6c] ss:$16 sps:$4 sm:$0xff]  }
 0x20b   :  { %2977 = vrcp.f32 %v619_v57  ;;  %v2976_v60 = vpop.eup %2975  ;;  %v632_v34 = vadd.f32 1.0, %v2974_v59  ;;  %v3537_v57 = vld [vmem:[%s3834_s1 + $0x60] ss:$16 sps:$4 sm:$0xff]  }
 0x20c   :  { %2979 = vrcp.f32 %v625_v58  ;;  %v3542_v58 = vld [vmem:[%s3834_s1 + $0x68] ss:$16 sps:$4 sm:$0xff]   ;;  %v3551_v59 = vld [vmem:[%s3834_s1 + $0x80] ss:$16 sps:$4 sm:$0xff]  }
 0x20d   :  { %2981 = vrcp.f32 %v632_v34  ;;  %v3577_v34 = vld [vmem:[%s3834_s1 + $0xac] ss:$16 sps:$4 sm:$0xff]  }
 0x215   :  { %v2978_v61 = vpop.eup %2977 }
 0x216   :  { %v2980_v62 = vpop.eup %2979  ;;  %v637_v63 = vmul.f32 %v2978_v61, %v2976_v60  ;;  %v3556_v60 = vld [vmem:[%s3834_s1 + $0x84] ss:$16 sps:$4 sm:$0xff]   ;;  %v3561_v61 = vld [vmem:[%s3834_s1 + $0x88] ss:$16 sps:$4 sm:$0xff]  }
 0x217   :  { %v636_v35 = vmul.f32 %v2980_v62, %v3340_v33  ;;  %v2982_v37 = vpop.eup %2981  ;;  %v3566_v62 = vld [vmem:[%s3834_s1 + $0x8c] ss:$16 sps:$4 sm:$0xff]  }
 0x219   :  { %v3393_v36 = vadd.f32 %v637_v63, %v636_v35  ;;  %v3571_v63 = vld [vmem:[%s3834_s1 + $0xa4] ss:$16 sps:$4 sm:$0xff]   ;;  %v3584_v35 = vld [vmem:[%s3834_s1 + $0xa0] ss:$16 sps:$4 sm:$0xff]  }
 0x21b   :  { %2983 = vtanh.f32 %v3393_v36 }
 0x225   :  { %v2984_v38 = vpop.eup %2983 }
 0x226   :  { %v640_v39 = vmul.f32 %v2984_v38, %v2982_v37  ;;  %v3596_v37 = vld [vmem:[%s3834_s1 + $0xc4] ss:$16 sps:$4 sm:$0xff]   ;;  %v3602_v38 = vld [vmem:[%s3834_s1 + $0xcc] ss:$16 sps:$4 sm:$0xff]  }
 0x228   :  { %v643_v40 = vpack.c.bf16 %v640_v39, %v640_v39  ;;  %v3608_v39 = vld [vmem:[%s3834_s1 + $0xc0] ss:$16 sps:$4 sm:$0xff]  }
 0x22a   :  { %2614 = vst [vmem:[%s3836_s2 + $0x4] sm:$0xf] %v643_v40  ;;  %878 = vmatmul.mubr.bf16.vlgmr.msra.gmra.mrb[8].mxu0 %v643_v40  ;;  %919 = vmatmul.mubr.bf16.vlgmr.msra.gmra.mrb[8].mxu1 %v643_v40  ;;  %v3615_v40 = vld [vmem:[%s3834_s1 + $0xc8] ss:$16 sps:$4 sm:$0xff]  }
 0x22b   :  { %1161 = vmatpush1.bf16.msra.mxu0 %v3108_v2  ;;  %1202 = vmatpush1.bf16.msra.mxu1 %v3136_v7  ;;  %v2615_v2 = vld [vmem:[%s3835_s0 + $0x40] sm:$0xff] }
 0x22c   :  { %1162 = vmatprep.subr.bf16.mxu0 %v3114_v3  ;;  %1203 = vmatprep.subr.bf16.mxu1 %v3155_v10  ;;  %v2616_v3 = vld [vmem:[%s3835_s0 + $0x48] sm:$0xff] }
 0x22d   :  { %1192 = vmatprep.mubr.bf16.mxu0 %v3081_v1  ;;  %1233 = vmatprep.mubr.bf16.mxu1 %v3081_v1 }
 0x22f   :  { %1163 = vmatpush1.bf16.msra.mxu0 %v3120_v4  ;;  %1204 = vmatpush1.bf16.msra.mxu1 %v3160_v11 }
 0x230   :  { %1164 = vmatprep.subr.bf16.mxu0 %v3126_v5  ;;  %1205 = vmatprep.subr.bf16.mxu1 %v3177_v14 }
 0x233   :  { %1165 = vmatpush1.bf16.msra.mxu0 %v3142_v8  ;;  %1206 = vmatpush1.bf16.msra.mxu1 %v3184_v15 }
 0x234   :  { %1166 = vmatprep.subr.bf16.mxu0 %v3149_v9  ;;  %1207 = vmatprep.subr.bf16.mxu1 %v3190_v16 }
 0x237   :  { %1167 = vmatpush1.bf16.msra.mxu0 %v3167_v12  ;;  %1208 = vmatpush1.bf16.msra.mxu1 %v3208_v19  ;;  %v2617_v19 = vld [vmem:[%s3835_s0 + $0x50] sm:$0xff] }
 0x238   :  { %1168 = vmatprep.subr.bf16.mxu0 %v3172_v13  ;;  %1209 = vmatprep.subr.bf16.mxu1 %v3214_v20 }
 0x23b   :  { %1169 = vmatpush1.bf16.msra.mxu0 %v3196_v17  ;;  %1210 = vmatpush1.bf16.msra.mxu1 %v3232_v23  ;;  %v2618_v17 = vld [vmem:[%s3835_s0 + $0x58] sm:$0xff] }
 0x23c   :  { %1170 = vmatprep.subr.bf16.mxu0 %v3202_v18  ;;  %1211 = vmatprep.subr.bf16.mxu1 %v3243_v25 }
 0x23f   :  { %1171 = vmatpush1.bf16.msra.mxu0 %v3220_v21  ;;  %1212 = vmatpush1.bf16.msra.mxu1 %v3253_v27 }
 0x240   :  { %1172 = vmatprep.subr.bf16.mxu0 %v3225_v22  ;;  %1213 = vmatprep.subr.bf16.mxu1 %v3259_v28 }
 0x243   :  { %1173 = vmatpush1.bf16.msra.mxu0 %v3237_v24  ;;  %1214 = vmatpush1.bf16.msra.mxu1 %v3272_v30 }
 0x244   :  { %1174 = vmatprep.subr.bf16.mxu0 %v3248_v26  ;;  %1215 = vmatprep.subr.bf16.mxu1 %v3278_v31 }
 0x247   :  { %1175 = vmatpush1.bf16.msra.mxu0 %v3266_v29  ;;  %1216 = vmatpush1.bf16.msra.mxu1 %v3288_v32 }
 0x248   :  { %1475 = vmatprep.subr.bf16.mxu0 %v3455_v45  ;;  %1516 = vmatprep.subr.bf16.mxu1 %v3460_v46 }
 0x2fd   :  { %v879_v4 = vpop.f32.mrb[8].mxu0  ;;  %v920_v5 = vpop.f32.mrb[8].mxu1 }
 0x2fe   :  { %v927_v7 = vadd.f32 %v2615_v2, %v879_v4  ;;  %v881_v8 = vpop.f32.mrb[9].mxu0  ;;  %v922_v9 = vpop.f32.mrb[9].mxu1  ;;  %v929_v21 = vadd.f32 %v2617_v19, %v920_v5  ;;  %v3620_v2 = vld [vmem:[%s3834_s1 + $0xe4] ss:$16 sps:$4 sm:$0xff]   ;;  %v3632_v4 = vld [vmem:[%s3834_s1 + $0xe0] ss:$16 sps:$4 sm:$0xff]  }
 0x2ff   :  { %v928_v10 = vadd.f32 %v2616_v3, %v881_v8  ;;  %v883_v11 = vpop.f32.mrb[10].mxu0  ;;  %v924_v12 = vpop.f32.mrb[10].mxu1  ;;  %v930_v18 = vadd.f32 %v2618_v17, %v922_v9  ;;  %v3626_v3 = vld [vmem:[%s3834_s1 + $0xec] ss:$16 sps:$4 sm:$0xff]   ;;  %v3639_v5 = vld [vmem:[%s3834_s1 + $0xe8] ss:$16 sps:$4 sm:$0xff]  }
 0x300   :  { %v2651_v13 = vmul.f32 -1.442695, %v927_v7  ;;  %v884_v14 = vpop.f32.mrb[11].mxu0  ;;  %v925_v15 = vpop.f32.mrb[11].mxu1  ;;  %v2655_v7 = vld [vmem:[%s3835_s0 + $0x60] sm:$0xff]  ;;  %v2656_v8 = vld [vmem:[%s3835_s0 + $0x68] sm:$0xff] }
 0x301   :  { %v2652_v16 = vmul.f32 -1.442695, %v928_v10  ;;  %v2653_v20 = vmul.f32 -1.442695, %v930_v18 }
 0x302   :  { %2985 = vpow2.f32 %v2651_v13 }
 0x303   :  { %2987 = vpow2.f32 %v2652_v16 }
 0x304   :  { %2989 = vpow2.f32 %v2653_v20 }
 0x305   :  { %2991 = vtanh.f32 %v929_v21  ;;  %v2658_v21 = vld [vmem:[%s3835_s0 + $0x78] sm:$0xff] }
 0x30c   :  { %v2986_v22 = vpop.eup %2985 }
 0x30d   :  { %v2988_v23 = vpop.eup %2987  ;;  %v934_v24 = vadd.f32 1.0, %v2986_v22 }
 0x30e   :  { %v940_v25 = vadd.f32 1.0, %v2988_v23  ;;  %v2990_v26 = vpop.eup %2989  ;;  %v2657_v23 = vld [vmem:[%s3835_s0 + $0x70] sm:$0xff] }
 0x30f   :  { %2993 = vrcp.f32 %v934_v24  ;;  %v2992_v27 = vpop.eup %2991  ;;  %v947_v31 = vadd.f32 1.0, %v2990_v26 }
 0x310   :  { %2995 = vrcp.f32 %v940_v25 }
 0x311   :  { %2997 = vrcp.f32 %v947_v31 }
 0x319   :  { %v2994_v28 = vpop.eup %2993 }
 0x31a   :  { %v2996_v29 = vpop.eup %2995  ;;  %v952_v30 = vmul.f32 %v2994_v28, %v2992_v27 }
 0x31b   :  { %v951_v32 = vmul.f32 %v2996_v29, %v3393_v36  ;;  %v2998_v41 = vpop.eup %2997  ;;  %v3591_v36 = vld [vmem:[%s3834_s1 + $0xa8] ss:$16 sps:$4 sm:$0xff]  }
 0x31d   :  { %v3444_v33 = vadd.f32 %v952_v30, %v951_v32 }
 0x31f   :  { %2999 = vtanh.f32 %v3444_v33 }
 0x329   :  { %v3000_v42 = vpop.eup %2999 }
 0x32a   :  { %v955_v43 = vmul.f32 %v3000_v42, %v2998_v41 }
 0x32c   :  { %v958_v44 = vpack.c.bf16 %v955_v43, %v955_v43 }
 0x32e   :  { %2654 = vst [vmem:[%s3836_s2 + $0x8] sm:$0xf] %v958_v44  ;;  %1193 = vmatmul.mubr.bf16.vlgmr.msra.gmra.mrb[12].mxu0 %v958_v44  ;;  %1234 = vmatmul.mubr.bf16.vlgmr.msra.gmra.mrb[12].mxu1 %v958_v44 }
 0x32f   :  { %1507 = vmatprep.mubr.bf16.mxu0 %v3081_v1  ;;  %1548 = vmatprep.mubr.bf16.mxu1 %v3081_v1 }
 0x330   :  { %1476 = vmatpush1.bf16.msra.mxu0 %v3465_v47  ;;  %1517 = vmatpush1.bf16.msra.mxu1 %v3470_v48 }
 0x331   :  { %1477 = vmatprep.subr.bf16.mxu0 %v3479_v0  ;;  %1518 = vmatprep.subr.bf16.mxu1 %v3484_v49 }
 0x334   :  { %1478 = vmatpush1.bf16.msra.mxu0 %v3489_v6  ;;  %1519 = vmatpush1.bf16.msra.mxu1 %v3494_v50 }
 0x335   :  { %1479 = vmatprep.subr.bf16.mxu0 %v3503_v51  ;;  %1520 = vmatprep.subr.bf16.mxu1 %v3508_v52 }
 0x338   :  { %1480 = vmatpush1.bf16.msra.mxu0 %v3513_v53  ;;  %1521 = vmatpush1.bf16.msra.mxu1 %v3518_v54 }
 0x339   :  { %1481 = vmatprep.subr.bf16.mxu0 %v3527_v55  ;;  %1522 = vmatprep.subr.bf16.mxu1 %v3532_v56 }
 0x33c   :  { %1482 = vmatpush1.bf16.msra.mxu0 %v3537_v57  ;;  %1523 = vmatpush1.bf16.msra.mxu1 %v3542_v58 }
 0x33d   :  { %1483 = vmatprep.subr.bf16.mxu0 %v3556_v60  ;;  %1524 = vmatprep.subr.bf16.mxu1 %v3566_v62 }
 0x340   :  { %1484 = vmatpush1.bf16.msra.mxu0 %v3551_v59  ;;  %1525 = vmatpush1.bf16.msra.mxu1 %v3561_v61 }
 0x341   :  { %1485 = vmatprep.subr.bf16.mxu0 %v3571_v63  ;;  %1526 = vmatprep.subr.bf16.mxu1 %v3577_v34 }
 0x344   :  { %1486 = vmatpush1.bf16.msra.mxu0 %v3584_v35  ;;  %1527 = vmatpush1.bf16.msra.mxu1 %v3591_v36 }
 0x345   :  { %1487 = vmatprep.subr.bf16.mxu0 %v3596_v37  ;;  %1528 = vmatprep.subr.bf16.mxu1 %v3602_v38 }
 0x348   :  { %1488 = vmatpush1.bf16.msra.mxu0 %v3608_v39  ;;  %1529 = vmatpush1.bf16.msra.mxu1 %v3615_v40 }
 0x349   :  { %1489 = vmatprep.subr.bf16.mxu0 %v3620_v2  ;;  %1530 = vmatprep.subr.bf16.mxu1 %v3626_v3 }
 0x34c   :  { %1490 = vmatpush1.bf16.msra.mxu0 %v3632_v4  ;;  %1531 = vmatpush1.bf16.msra.mxu1 %v3639_v5 }
 0x34d   :  { %1790 = vmatprep.subr.bf16.mxu0 %v3455_v45  ;;  %1831 = vmatprep.subr.bf16.mxu1 %v3460_v46 }
 0x401   :  { %v1194_v9 = vpop.f32.mrb[12].mxu0  ;;  %v1235_v10 = vpop.f32.mrb[12].mxu1 }
 0x402   :  { %v1242_v11 = vadd.f32 %v2655_v7, %v1194_v9  ;;  %v1196_v12 = vpop.f32.mrb[13].mxu0  ;;  %v1237_v13 = vpop.f32.mrb[13].mxu1  ;;  %v1244_v25 = vadd.f32 %v2657_v23, %v1235_v10 }
 0x403   :  { %v1243_v14 = vadd.f32 %v2656_v8, %v1196_v12  ;;  %v1198_v15 = vpop.f32.mrb[14].mxu0  ;;  %v1239_v16 = vpop.f32.mrb[14].mxu1  ;;  %v1245_v22 = vadd.f32 %v2658_v21, %v1237_v13  ;;  %v2696_v12 = vld [vmem:[%s3835_s0 + $0x88] sm:$0xff] }
 0x404   :  { %v2691_v17 = vmul.f32 -1.442695, %v1242_v11  ;;  %v1199_v18 = vpop.f32.mrb[15].mxu0  ;;  %v1240_v19 = vpop.f32.mrb[15].mxu1 }
 0x405   :  { %v2692_v20 = vmul.f32 -1.442695, %v1243_v14  ;;  %v2693_v24 = vmul.f32 -1.442695, %v1245_v22 }
 0x406   :  { %3001 = vpow2.f32 %v2691_v17 }
 0x407   :  { %3003 = vpow2.f32 %v2692_v20 }
 0x408   :  { %3005 = vpow2.f32 %v2693_v24 }
 0x409   :  { %3007 = vtanh.f32 %v1244_v25  ;;  %v2698_v25 = vld [vmem:[%s3835_s0 + $0x98] sm:$0xff] }
 0x410   :  { %v3002_v26 = vpop.eup %3001 }
 0x411   :  { %v3004_v27 = vpop.eup %3003  ;;  %v1249_v28 = vadd.f32 1.0, %v3002_v26 }
 0x412   :  { %v1255_v29 = vadd.f32 1.0, %v3004_v27  ;;  %v3006_v30 = vpop.eup %3005  ;;  %v2697_v27 = vld [vmem:[%s3835_s0 + $0x90] sm:$0xff] }
 0x413   :  { %3009 = vrcp.f32 %v1249_v28  ;;  %v3008_v31 = vpop.eup %3007  ;;  %v1262_v43 = vadd.f32 1.0, %v3006_v30 }
 0x414   :  { %3011 = vrcp.f32 %v1255_v29 }
 0x415   :  { %3013 = vrcp.f32 %v1262_v43 }
 0x41d   :  { %v3010_v32 = vpop.eup %3009 }
 0x41e   :  { %v3012_v41 = vpop.eup %3011  ;;  %v1267_v42 = vmul.f32 %v3010_v32, %v3008_v31 }
 0x41f   :  { %v1266_v44 = vmul.f32 %v3012_v41, %v3444_v33  ;;  %v3014_v8 = vpop.eup %3013  ;;  %v2695_v33 = vld [vmem:[%s3835_s0 + $0x80] sm:$0xff] }
 0x421   :  { %v3659_v7 = vadd.f32 %v1267_v42, %v1266_v44 }
 0x423   :  { %3015 = vtanh.f32 %v3659_v7 }
 0x42d   :  { %v3016_v9 = vpop.eup %3015 }
 0x42e   :  { %v1270_v10 = vmul.f32 %v3016_v9, %v3014_v8 }
 0x430   :  { %v1273_v11 = vpack.c.bf16 %v1270_v10, %v1270_v10 }
 0x432   :  { %2694 = vst [vmem:[%s3836_s2 + $0xc] sm:$0xf] %v1273_v11  ;;  %1508 = vmatmul.mubr.bf16.vlgmr.msra.gmra.mrb[16].mxu0 %v1273_v11  ;;  %1549 = vmatmul.mubr.bf16.vlgmr.msra.gmra.mrb[16].mxu1 %v1273_v11 }
 0x433   :  { %1791 = vmatpush1.bf16.msra.mxu0 %v3465_v47  ;;  %1832 = vmatpush1.bf16.msra.mxu1 %v3470_v48 }
 0x434   :  { %1792 = vmatprep.subr.bf16.mxu0 %v3479_v0  ;;  %1833 = vmatprep.subr.bf16.mxu1 %v3484_v49 }
 0x435   :  { %1822 = vmatprep.mubr.bf16.mxu0 %v3081_v1  ;;  %1863 = vmatprep.mubr.bf16.mxu1 %v3081_v1 }
 0x437   :  { %1793 = vmatpush1.bf16.msra.mxu0 %v3489_v6  ;;  %1834 = vmatpush1.bf16.msra.mxu1 %v3494_v50 }
 0x438   :  { %1794 = vmatprep.subr.bf16.mxu0 %v3503_v51  ;;  %1835 = vmatprep.subr.bf16.mxu1 %v3508_v52 }
 0x43b   :  { %1795 = vmatpush1.bf16.msra.mxu0 %v3513_v53  ;;  %1836 = vmatpush1.bf16.msra.mxu1 %v3518_v54 }
 0x43c   :  { %1796 = vmatprep.subr.bf16.mxu0 %v3527_v55  ;;  %1837 = vmatprep.subr.bf16.mxu1 %v3532_v56 }
 0x43f   :  { %1797 = vmatpush1.bf16.msra.mxu0 %v3537_v57  ;;  %1838 = vmatpush1.bf16.msra.mxu1 %v3542_v58 }
 0x440   :  { %1798 = vmatprep.subr.bf16.mxu0 %v3556_v60  ;;  %1839 = vmatprep.subr.bf16.mxu1 %v3566_v62 }
 0x443   :  { %1799 = vmatpush1.bf16.msra.mxu0 %v3551_v59  ;;  %1840 = vmatpush1.bf16.msra.mxu1 %v3561_v61 }
 0x444   :  { %1800 = vmatprep.subr.bf16.mxu0 %v3571_v63  ;;  %1841 = vmatprep.subr.bf16.mxu1 %v3577_v34 }
 0x447   :  { %1801 = vmatpush1.bf16.msra.mxu0 %v3584_v35  ;;  %1842 = vmatpush1.bf16.msra.mxu1 %v3591_v36 }
 0x448   :  { %1802 = vmatprep.subr.bf16.mxu0 %v3596_v37  ;;  %1843 = vmatprep.subr.bf16.mxu1 %v3602_v38 }
 0x44b   :  { %1803 = vmatpush1.bf16.msra.mxu0 %v3608_v39  ;;  %1844 = vmatpush1.bf16.msra.mxu1 %v3615_v40 }
 0x44c   :  { %1804 = vmatprep.subr.bf16.mxu0 %v3620_v2  ;;  %1845 = vmatprep.subr.bf16.mxu1 %v3626_v3 }
 0x44f   :  { %1805 = vmatpush1.bf16.msra.mxu0 %v3632_v4  ;;  %1846 = vmatpush1.bf16.msra.mxu1 %v3639_v5 }
 0x450   :  { %2105 = vmatprep.subr.bf16.mxu0 %v3455_v45  ;;  %2146 = vmatprep.subr.bf16.mxu1 %v3460_v46 }
 0x505   :  { %v1509_v13 = vpop.f32.mrb[16].mxu0  ;;  %v1550_v14 = vpop.f32.mrb[16].mxu1 }
 0x506   :  { %v1557_v15 = vadd.f32 %v2695_v33, %v1509_v13  ;;  %v1511_v16 = vpop.f32.mrb[17].mxu0  ;;  %v1552_v17 = vpop.f32.mrb[17].mxu1  ;;  %v1559_v29 = vadd.f32 %v2697_v27, %v1550_v14  ;;  %v2738_v27 = vld [vmem:[%s3835_s0 + $0xb8] sm:$0xff] }
 0x507   :  { %v1558_v18 = vadd.f32 %v2696_v12, %v1511_v16  ;;  %v1513_v19 = vpop.f32.mrb[18].mxu0  ;;  %v1554_v20 = vpop.f32.mrb[18].mxu1  ;;  %v1560_v26 = vadd.f32 %v2698_v25, %v1552_v17  ;;  %v2736_v16 = vld [vmem:[%s3835_s0 + $0xa8] sm:$0xff] }
 0x508   :  { %v2731_v21 = vmul.f32 -1.442695, %v1557_v15  ;;  %v1514_v22 = vpop.f32.mrb[19].mxu0  ;;  %v1555_v23 = vpop.f32.mrb[19].mxu1 }
 0x509   :  { %v2732_v24 = vmul.f32 -1.442695, %v1558_v18  ;;  %v2733_v28 = vmul.f32 -1.442695, %v1560_v26 }
 0x50a   :  { %3017 = vpow2.f32 %v2731_v21 }
 0x50b   :  { %3019 = vpow2.f32 %v2732_v24 }
 0x50c   :  { %3021 = vpow2.f32 %v2733_v28 }
 0x50d   :  { %3023 = vtanh.f32 %v1559_v29  ;;  %v2737_v29 = vld [vmem:[%s3835_s0 + $0xb0] sm:$0xff] }
 0x514   :  { %v3018_v30 = vpop.eup %3017 }
 0x515   :  { %v3020_v31 = vpop.eup %3019  ;;  %v1564_v32 = vadd.f32 1.0, %v3018_v30 }
 0x516   :  { %v1570_v41 = vadd.f32 1.0, %v3020_v31  ;;  %v3022_v42 = vpop.eup %3021 }
 0x517   :  { %3025 = vrcp.f32 %v1564_v32  ;;  %v3024_v43 = vpop.eup %3023  ;;  %v1577_v10 = vadd.f32 1.0, %v3022_v42 }
 0x518   :  { %3027 = vrcp.f32 %v1570_v41 }
 0x519   :  { %3029 = vrcp.f32 %v1577_v10 }
 0x521   :  { %v3026_v44 = vpop.eup %3025 }
 0x522   :  { %v3028_v8 = vpop.eup %3027  ;;  %v1582_v9 = vmul.f32 %v3026_v44, %v3024_v43 }
 0x523   :  { %v1581_v11 = vmul.f32 %v3028_v8, %v3659_v7  ;;  %v3030_v12 = vpop.eup %3029  ;;  %v2735_v7 = vld [vmem:[%s3835_s0 + $0xa0] sm:$0xff] }
 0x525   :  { %v3712_v33 = vadd.f32 %v1582_v9, %v1581_v11 }
 0x527   :  { %3031 = vtanh.f32 %v3712_v33 }
 0x531   :  { %v3032_v13 = vpop.eup %3031 }
 0x532   :  { %v1585_v14 = vmul.f32 %v3032_v13, %v3030_v12 }
 0x534   :  { %v1588_v15 = vpack.c.bf16 %v1585_v14, %v1585_v14 }
 0x536   :  { %2734 = vst [vmem:[%s3836_s2 + $0x10] sm:$0xf] %v1588_v15  ;;  %1823 = vmatmul.mubr.bf16.vlgmr.msra.gmra.mrb[20].mxu0 %v1588_v15  ;;  %1864 = vmatmul.mubr.bf16.vlgmr.msra.gmra.mrb[20].mxu1 %v1588_v15 }
 0x537   :  { %2106 = vmatpush1.bf16.msra.mxu0 %v3465_v47  ;;  %2147 = vmatpush1.bf16.msra.mxu1 %v3470_v48 }
 0x538   :  { %2107 = vmatprep.subr.bf16.mxu0 %v3479_v0  ;;  %2148 = vmatprep.subr.bf16.mxu1 %v3484_v49 }
 0x539   :  { %2137 = vmatprep.mubr.bf16.mxu0 %v3081_v1  ;;  %2178 = vmatprep.mubr.bf16.mxu1 %v3081_v1 }
 0x53b   :  { %2108 = vmatpush1.bf16.msra.mxu0 %v3489_v6  ;;  %2149 = vmatpush1.bf16.msra.mxu1 %v3494_v50 }
 0x53c   :  { %2109 = vmatprep.subr.bf16.mxu0 %v3503_v51  ;;  %2150 = vmatprep.subr.bf16.mxu1 %v3508_v52 }
 0x53f   :  { %2110 = vmatpush1.bf16.msra.mxu0 %v3513_v53  ;;  %2151 = vmatpush1.bf16.msra.mxu1 %v3518_v54 }
 0x540   :  { %2111 = vmatprep.subr.bf16.mxu0 %v3527_v55  ;;  %2152 = vmatprep.subr.bf16.mxu1 %v3532_v56 }
 0x543   :  { %2112 = vmatpush1.bf16.msra.mxu0 %v3537_v57  ;;  %2153 = vmatpush1.bf16.msra.mxu1 %v3542_v58 }
 0x544   :  { %2113 = vmatprep.subr.bf16.mxu0 %v3556_v60  ;;  %2154 = vmatprep.subr.bf16.mxu1 %v3566_v62 }
 0x547   :  { %2114 = vmatpush1.bf16.msra.mxu0 %v3551_v59  ;;  %2155 = vmatpush1.bf16.msra.mxu1 %v3561_v61 }
 0x548   :  { %2115 = vmatprep.subr.bf16.mxu0 %v3571_v63  ;;  %2156 = vmatprep.subr.bf16.mxu1 %v3577_v34 }
 0x54b   :  { %2116 = vmatpush1.bf16.msra.mxu0 %v3584_v35  ;;  %2157 = vmatpush1.bf16.msra.mxu1 %v3591_v36 }
 0x54c   :  { %2117 = vmatprep.subr.bf16.mxu0 %v3596_v37  ;;  %2158 = vmatprep.subr.bf16.mxu1 %v3602_v38 }
 0x54f   :  { %2118 = vmatpush1.bf16.msra.mxu0 %v3608_v39  ;;  %2159 = vmatpush1.bf16.msra.mxu1 %v3615_v40 }
 0x550   :  { %2119 = vmatprep.subr.bf16.mxu0 %v3620_v2  ;;  %2160 = vmatprep.subr.bf16.mxu1 %v3626_v3 }
 0x553   :  { %2120 = vmatpush1.bf16.msra.mxu0 %v3632_v4  ;;  %2161 = vmatpush1.bf16.msra.mxu1 %v3639_v5 }
 0x554   :  { %2420 = vmatprep.subr.bf16.mxu0 %v3455_v45  ;;  %2461 = vmatprep.subr.bf16.mxu1 %v3460_v46 }
 0x609   :  { %v1824_v17 = vpop.f32.mrb[20].mxu0  ;;  %v1865_v18 = vpop.f32.mrb[20].mxu1 }
 0x60a   :  { %v1872_v19 = vadd.f32 %v2735_v7, %v1824_v17  ;;  %v1826_v20 = vpop.f32.mrb[21].mxu0  ;;  %v1867_v21 = vpop.f32.mrb[21].mxu1  ;;  %v1874_v31 = vadd.f32 %v2737_v29, %v1865_v18 }
 0x60b   :  { %v1873_v22 = vadd.f32 %v2736_v16, %v1826_v20  ;;  %v1828_v23 = vpop.f32.mrb[22].mxu0  ;;  %v1869_v24 = vpop.f32.mrb[22].mxu1  ;;  %v1875_v28 = vadd.f32 %v2738_v27, %v1867_v21  ;;  %v2815_v21 = vld [vmem:[%s3835_s0 + $0xe0] sm:$0xff] }
 0x60c   :  { %v2771_v25 = vmul.f32 -1.442695, %v1872_v19  ;;  %v1829_v45 = vpop.f32.mrb[23].mxu0  ;;  %v1870_v26 = vpop.f32.mrb[23].mxu1 }
 0x60d   :  { %v2772_v46 = vmul.f32 -1.442695, %v1873_v22  ;;  %v2773_v30 = vmul.f32 -1.442695, %v1875_v28  ;;  %v2816_v22 = vld [vmem:[%s3835_s0 + $0xe8] sm:$0xff] }
 0x60e   :  { %3033 = vpow2.f32 %v2771_v25 }
 0x60f   :  { %3035 = vpow2.f32 %v2772_v46 }
 0x610   :  { %3037 = vpow2.f32 %v2773_v30 }
 0x611   :  { %3039 = vtanh.f32 %v1874_v31 }
 0x618   :  { %v3034_v32 = vpop.eup %3033 }
 0x619   :  { %v3036_v41 = vpop.eup %3035  ;;  %v1879_v42 = vadd.f32 1.0, %v3034_v32 }
 0x61a   :  { %v1885_v43 = vadd.f32 1.0, %v3036_v41  ;;  %v3038_v44 = vpop.eup %3037  ;;  %v2818_v41 = vld [vmem:[%s3835_s0 + $0xf8] sm:$0xff] }
 0x61b   :  { %3041 = vrcp.f32 %v1879_v42  ;;  %v3040_v8 = vpop.eup %3039  ;;  %v1892_v12 = vadd.f32 1.0, %v3038_v44 }
 0x61c   :  { %3043 = vrcp.f32 %v1885_v43  ;;  %v2817_v43 = vld [vmem:[%s3835_s0 + $0xf0] sm:$0xff] }
 0x61d   :  { %3045 = vrcp.f32 %v1892_v12 }
 0x625   :  { %v3042_v9 = vpop.eup %3041 }
 0x626   :  { %v3044_v10 = vpop.eup %3043  ;;  %v1897_v11 = vmul.f32 %v3042_v9, %v3040_v8 }
 0x627   :  { %v1896_v13 = vmul.f32 %v3044_v10, %v3712_v33  ;;  %v3046_v15 = vpop.eup %3045 }
 0x629   :  { %v3765_v14 = vadd.f32 %v1897_v11, %v1896_v13 }
 0x62b   :  { %3047 = vtanh.f32 %v3765_v14 }
 0x635   :  { %v3048_v7 = vpop.eup %3047 }
 0x636   :  { %v1900_v16 = vmul.f32 %v3048_v7, %v3046_v15 }
 0x638   :  { %v1903_v17 = vpack.c.bf16 %v1900_v16, %v1900_v16 }
 0x63a   :  { %2774 = vst [vmem:[%s3836_s2 + $0x14] sm:$0xf] %v1903_v17  ;;  %2138 = vmatmul.mubr.bf16.vlgmr.msra.gmra.mrb[24].mxu0 %v1903_v17  ;;  %2179 = vmatmul.mubr.bf16.vlgmr.msra.gmra.mrb[24].mxu1 %v1903_v17 }
 0x63b   :  { %2421 = vmatpush1.bf16.msra.mxu0 %v3465_v47  ;;  %2462 = vmatpush1.bf16.msra.mxu1 %v3470_v48  ;;  %v2776_v47 = vld [vmem:[%s3835_s0 + $0xc8] sm:$0xff] }
 0x63c   :  { %2422 = vmatprep.subr.bf16.mxu0 %v3479_v0  ;;  %2463 = vmatprep.subr.bf16.mxu1 %v3484_v49 }
 0x63d   :  { %2452 = vmatprep.mubr.bf16.mxu0 %v3081_v1  ;;  %2493 = vmatprep.mubr.bf16.mxu1 %v3081_v1  ;;  %v2775_v1 = vld [vmem:[%s3835_s0 + $0xc0] sm:$0xff] }
 0x63f   :  { %2423 = vmatpush1.bf16.msra.mxu0 %v3489_v6  ;;  %2464 = vmatpush1.bf16.msra.mxu1 %v3494_v50 }
 0x640   :  { %2424 = vmatprep.subr.bf16.mxu0 %v3503_v51  ;;  %2465 = vmatprep.subr.bf16.mxu1 %v3508_v52 }
 0x643   :  { %2425 = vmatpush1.bf16.msra.mxu0 %v3513_v53  ;;  %2466 = vmatpush1.bf16.msra.mxu1 %v3518_v54 }
 0x644   :  { %2426 = vmatprep.subr.bf16.mxu0 %v3527_v55  ;;  %2467 = vmatprep.subr.bf16.mxu1 %v3532_v56 }
 0x647   :  { %2427 = vmatpush1.bf16.msra.mxu0 %v3537_v57  ;;  %2468 = vmatpush1.bf16.msra.mxu1 %v3542_v58  ;;  %v2778_v58 = vld [vmem:[%s3835_s0 + $0xd8] sm:$0xff] }
 0x648   :  { %2428 = vmatprep.subr.bf16.mxu0 %v3556_v60  ;;  %2469 = vmatprep.subr.bf16.mxu1 %v3566_v62  ;;  %v2777_v60 = vld [vmem:[%s3835_s0 + $0xd0] sm:$0xff] }
 0x64b   :  { %2429 = vmatpush1.bf16.msra.mxu0 %v3551_v59  ;;  %2470 = vmatpush1.bf16.msra.mxu1 %v3561_v61 }
 0x64c   :  { %2430 = vmatprep.subr.bf16.mxu0 %v3571_v63  ;;  %2471 = vmatprep.subr.bf16.mxu1 %v3577_v34 }
 0x64f   :  { %2431 = vmatpush1.bf16.msra.mxu0 %v3584_v35  ;;  %2472 = vmatpush1.bf16.msra.mxu1 %v3591_v36 }
 0x650   :  { %2432 = vmatprep.subr.bf16.mxu0 %v3596_v37  ;;  %2473 = vmatprep.subr.bf16.mxu1 %v3602_v38 }
 0x653   :  { %2433 = vmatpush1.bf16.msra.mxu0 %v3608_v39  ;;  %2474 = vmatpush1.bf16.msra.mxu1 %v3615_v40 }
 0x654   :  { %2434 = vmatprep.subr.bf16.mxu0 %v3620_v2  ;;  %2475 = vmatprep.subr.bf16.mxu1 %v3626_v3 }
 0x657   :  { %2435 = vmatpush1.bf16.msra.mxu0 %v3632_v4  ;;  %2476 = vmatpush1.bf16.msra.mxu1 %v3639_v5 }
 0x70d   :  { %v2139_v48 = vpop.f32.mrb[24].mxu0  ;;  %v2180_v0 = vpop.f32.mrb[24].mxu1 }
 0x70e   :  { %v2187_v49 = vadd.f32 %v2775_v1, %v2139_v48  ;;  %v2141_v6 = vpop.f32.mrb[25].mxu0  ;;  %v2182_v50 = vpop.f32.mrb[25].mxu1  ;;  %v2189_v62 = vadd.f32 %v2777_v60, %v2180_v0 }
 0x70f   :  { %v2188_v51 = vadd.f32 %v2776_v47, %v2141_v6  ;;  %v2143_v52 = vpop.f32.mrb[26].mxu0  ;;  %v2184_v53 = vpop.f32.mrb[26].mxu1  ;;  %v2190_v59 = vadd.f32 %v2778_v58, %v2182_v50 }
 0x710   :  { %v2811_v54 = vmul.f32 -1.442695, %v2187_v49  ;;  %v2144_v55 = vpop.f32.mrb[27].mxu0  ;;  %v2185_v56 = vpop.f32.mrb[27].mxu1 }
 0x711   :  { %v2812_v57 = vmul.f32 -1.442695, %v2188_v51  ;;  %v2813_v61 = vmul.f32 -1.442695, %v2190_v59 }
 0x712   :  { %3049 = vpow2.f32 %v2811_v54 }
 0x713   :  { %3051 = vpow2.f32 %v2812_v57 }
 0x714   :  { %3053 = vpow2.f32 %v2813_v61 }
 0x715   :  { %3055 = vtanh.f32 %v2189_v62 }
 0x71c   :  { %v3050_v63 = vpop.eup %3049 }
 0x71d   :  { %v3052_v34 = vpop.eup %3051  ;;  %v2194_v35 = vadd.f32 1.0, %v3050_v63 }
 0x71e   :  { %v2200_v36 = vadd.f32 1.0, %v3052_v34  ;;  %v3054_v37 = vpop.eup %3053 }
 0x71f   :  { %3057 = vrcp.f32 %v2194_v35  ;;  %v3056_v38 = vpop.eup %3055  ;;  %v2207_v3 = vadd.f32 1.0, %v3054_v37 }
 0x720   :  { %3059 = vrcp.f32 %v2200_v36 }
 0x721   :  { %3061 = vrcp.f32 %v2207_v3 }
 0x729   :  { %v3058_v39 = vpop.eup %3057 }
 0x72a   :  { %v3060_v40 = vpop.eup %3059  ;;  %v2212_v2 = vmul.f32 %v3058_v39, %v3056_v38 }
 0x72b   :  { %v2211_v4 = vmul.f32 %v3060_v40, %v3765_v14  ;;  %v3062_v33 = vpop.eup %3061 }
 0x72d   :  { %v2213_v5 = vadd.f32 %v2212_v2, %v2211_v4 }
 0x72f   :  { %3063 = vtanh.f32 %v2213_v5 }
 0x739   :  { %v3064_v18 = vpop.eup %3063 }
 0x73a   :  { %v2215_v19 = vmul.f32 %v3064_v18, %v3062_v33 }
 0x73c   :  { %v2218_v20 = vpack.c.bf16 %v2215_v19, %v2215_v19 }
 0x73e   :  { %2814 = vst [vmem:[%s3836_s2 + $0x18] sm:$0xf] %v2218_v20  ;;  %2453 = vmatmul.mubr.bf16.vlgmr.msra.gmra.mrb[28].mxu0 %v2218_v20  ;;  %2494 = vmatmul.mubr.bf16.vlgmr.msra.gmra.mrb[28].mxu1 %v2218_v20 }
 0x811   :  { %v2454_v23 = vpop.f32.mrb[28].mxu0  ;;  %v2495_v24 = vpop.f32.mrb[28].mxu1 }
 0x812   :  { %v2502_v25 = vadd.f32 %v2815_v21, %v2454_v23  ;;  %v2456_v45 = vpop.f32.mrb[29].mxu0  ;;  %v2497_v26 = vpop.f32.mrb[29].mxu1  ;;  %v2504_v8 = vadd.f32 %v2817_v43, %v2495_v24 }
 0x813   :  { %v2503_v46 = vadd.f32 %v2816_v22, %v2456_v45  ;;  %v2458_v27 = vpop.f32.mrb[30].mxu0  ;;  %v2499_v28 = vpop.f32.mrb[30].mxu1  ;;  %v2505_v42 = vadd.f32 %v2818_v41, %v2497_v26 }
 0x814   :  { %v2851_v29 = vmul.f32 -1.442695, %v2502_v25  ;;  %v2459_v30 = vpop.f32.mrb[31].mxu0  ;;  %v2500_v31 = vpop.f32.mrb[31].mxu1 }
 0x815   :  { %v2852_v32 = vmul.f32 -1.442695, %v2503_v46  ;;  %v2853_v44 = vmul.f32 -1.442695, %v2505_v42 }
 0x816   :  { %3065 = vpow2.f32 %v2851_v29 }
 0x817   :  { %3067 = vpow2.f32 %v2852_v32 }
 0x818   :  { %3069 = vpow2.f32 %v2853_v44 }
 0x819   :  { %3071 = vtanh.f32 %v2504_v8 }
 0x820   :  { %v3066_v9 = vpop.eup %3065 }
 0x821   :  { %v3068_v10 = vpop.eup %3067  ;;  %v2509_v11 = vadd.f32 1.0, %v3066_v9 }
 0x822   :  { %v2515_v12 = vadd.f32 1.0, %v3068_v10  ;;  %v3070_v13 = vpop.eup %3069 }
 0x823   :  { %3073 = vrcp.f32 %v2509_v11  ;;  %v3072_v14 = vpop.eup %3071  ;;  %v2522_v17 = vadd.f32 1.0, %v3070_v13 }
 0x824   :  { %3075 = vrcp.f32 %v2515_v12 }
 0x825   :  { %3077 = vrcp.f32 %v2522_v17 }
 0x82d   :  { %v3074_v15 = vpop.eup %3073 }
 0x82e   :  { %v3076_v7 = vpop.eup %3075  ;;  %v2527_v16 = vmul.f32 %v3074_v15, %v3072_v14 }
 0x82f   :  { %v2526_v1 = vmul.f32 %v3076_v7, %v2213_v5  ;;  %v3078_v48 = vpop.eup %3077 }
 0x831   :  { %v2528_v47 = vadd.f32 %v2527_v16, %v2526_v1 }
 0x833   :  { %3079 = vtanh.f32 %v2528_v47 }
 0x83d   :  { %v3080_v0 = vpop.eup %3079 }
 0x83e   :  { %v2530_v49 = vmul.f32 %v3080_v0, %v3078_v48 }
 0x840   :  { %v2533_v6 = vpack.c.bf16 %v2530_v49, %v2530_v49 }
 0x842   :  { %2854 = vst [vmem:[%s3836_s2 + $0x1c] sm:$0xf] %v2533_v6 }

</bundles_post_ra>
